<compile_context>
chip_gen: v6e
topology: v6e:2x2x1
jax: 0.10.0
libtpu: 0.0.40
codegen_flags: <defaults>
</compile_context>

<pallas_src>
import functools

import jax
import jax.numpy as jnp
from jax.experimental import pallas as pl
from jax.experimental.pallas import tpu as pltpu


def st_layer_kernel(x_ref, wa_ref, wb_ref, gwT_ref, supT_ref, wsk_ref, vec_ref,
                    out_ref, skip_ref, *, C, O, S, K, To, Np, dil, mxu_dtype):
    """One batch element per grid step.

    x_ref   : (C, T*Np)   mxu_dtype  node-padded, (t, n)-flattened lanes
    wa_ref  : (2O, C)     mxu_dtype  rows [w1a ; w2a]  (tap 0 weights)
    wb_ref  : (2O, C)     mxu_dtype  rows [w1b ; w2b]  (dilated-tap weights)
    gwT_ref : (K, O, O)   mxu_dtype  gwT[k] = gw[k]^T
    supT_ref: (K, Np, Np) mxu_dtype  supT[k] = sup[k]^T (zero padded)
    wsk_ref : (S, O)      mxu_dtype
    vec_ref : (4O+S, 1)   f32        [b1; b2; b_skip; bn_scale; bn_shift(+folded gcn bias)]
    out_ref : (O, To*Np)  mxu_dtype
    skip_ref: (S, Np)     f32
    """
    TNp = To * Np
    f32 = jnp.float32

    # ---- gated TCN: two lane-aligned taps of the SAME x block, two accumulating dots ----
    tap0 = x_ref[:, :TNp]                                   # (C, To*Np)
    tap1 = x_ref[:, dil * Np: dil * Np + TNp]               # (C, To*Np)  (offset is 128-aligned)
    zz = (jnp.dot(wa_ref[...], tap0, preferred_element_type=f32)
          + jnp.dot(wb_ref[...], tap1, preferred_element_type=f32))     # (2O, To*Np) f32
    zz = zz + vec_ref[0:2 * O]                              # [b1 ; b2]
    # sigmoid(x) = 0.5*(tanh(x/2)+1): keeps the transcendental on the EUP slot.
    gate = jnp.tanh(zz[:O]) * (0.5 * (jnp.tanh(0.5 * zz[O:]) + 1.0))     # (O, To*Np) f32

    # ---- skip: Conv1d(O->S, k=1) on the last time step (128-aligned lane slice) ----
    g_last = gate[:, (To - 1) * Np:].astype(mxu_dtype)      # (O, Np)
    skip_ref[...] = (jnp.dot(wsk_ref[...], g_last, preferred_element_type=f32)
                     + vec_ref[2 * O:2 * O + S])

    # ---- GraphConv ----
    # One relayout of the gate to (t, o)-major rows / node-minor lanes, then cast
    # once to the MXU dtype (aligned slices; the concat is the proven f32 pattern).
    gate_tn = jnp.concatenate(
        [gate[:, t * Np:(t + 1) * Np] for t in range(To)], axis=0).astype(mxu_dtype)  # (To*O, Np)

    gcn = None
    for k in range(K):                                      # K is small & static
        hop = jnp.dot(gate_tn, supT_ref[k],
                      preferred_element_type=f32)           # (To*O, Np) node mix, big-M dot
        # cast each (O, Np) row block to the MXU dtype BEFORE the lane-concat so the
        # materialized relayout buffer and the channel-mix operand are low precision.
        hop_otn = jnp.concatenate(
            [hop[t * O:(t + 1) * O, :].astype(mxu_dtype) for t in range(To)],
            axis=1)                                         # (O, To*Np)
        contrib = jnp.dot(gwT_ref[k], hop_otn,
                          preferred_element_type=f32)       # per-support channel mix
        gcn = contrib if gcn is None else gcn + contrib
    # TODO(synk): F.dropout omitted (eval-mode forward; training-mode dropout not implemented).

    # ---- residual (dilated tap, reloaded so the tap value need not stay live) + BN ----
    # (GraphConv bias is pre-folded into the BN shift in the wrapper.)
    res = x_ref[:, dil * Np: dil * Np + TNp].astype(f32)    # (C == O, To*Np)
    scale = vec_ref[2 * O + S:3 * O + S]
    shift = vec_ref[3 * O + S:4 * O + S]
    out_ref[...] = ((gcn + res) * scale + shift).astype(out_ref.dtype)


def st_layer_forward(x_nchw, supports, params, *, dilation, mxu_dtype=jnp.bfloat16):
    B, C, N, T = x_nchw.shape
    To = T - dilation
    O = params['w1'].shape[0]
    S = params['wskip'].shape[0]
    K = supports.shape[0]
    assert C == O, "residual connection requires input_size == output_size"
    Np = ((N + 127) // 128) * 128                 # lane-dense node axis
    TNp = To * Np
    f32 = jnp.float32
    act_bytes = jnp.dtype(mxu_dtype).itemsize

    # --- single padded activation tensor, streamed in the MXU dtype (no xcat copy) ---
    xt = jnp.transpose(x_nchw, (0, 1, 3, 2))                              # (B, C, T, N)
    xt = jnp.pad(xt, ((0, 0), (0, 0), (0, 0), (0, Np - N)))
    x_p = xt.reshape(B, C, T * Np).astype(mxu_dtype)                      # (B, C, T*Np)

    # --- weights packed for 2-D dots ---
    w1a, w1b = params['w1'][:, :, 0, 0], params['w1'][:, :, 0, 1]
    w2a, w2b = params['w2'][:, :, 0, 0], params['w2'][:, :, 0, 1]
    wa = jnp.concatenate([w1a, w2a], axis=0).astype(mxu_dtype)            # (2O, C) tap 0
    wb = jnp.concatenate([w1b, w2b], axis=0).astype(mxu_dtype)            # (2O, C) dilated tap
    gwT = jnp.transpose(params['gw'], (0, 2, 1)).astype(mxu_dtype)        # (K, O, O)
    wsk = params['wskip'][:, :, 0].astype(mxu_dtype)                      # (S, O)
    supT = jnp.pad(supports, ((0, 0), (0, Np - N), (0, Np - N)))
    supT = jnp.transpose(supT, (0, 2, 1)).astype(mxu_dtype)               # (K, Np, Np)

    # --- per-channel vectors packed into one f32 operand; GraphConv bias + BN
    #     running stats folded into a single affine ---
    eps = 1e-5
    scale = params['bn_gamma'] / jnp.sqrt(params['bn_var'] + eps)
    shift = params['bn_beta'] - params['bn_mean'] * scale + params['gb'] * scale
    vec = jnp.concatenate([params['b1'], params['b2'], params['bskip'],
                           scale, shift]).astype(f32)[:, None]            # (4O+S, 1)
    R = vec.shape[0]

    kernel = functools.partial(st_layer_kernel, C=C, O=O, S=S, K=K,
                               To=To, Np=Np, dil=dilation, mxu_dtype=mxu_dtype)

    # --- cost estimate + VMEM budget from the actual per-step footprint ---
    flops = 2 * B * (2 * (2 * O) * C * TNp          # two accumulating TCN dots
                     + K * (To * O) * Np * Np       # node mixes
                     + K * O * O * TNp              # per-support channel mixes
                     + S * O * Np)                  # skip head
    w_bytes = (2 * (2 * O) * C + K * O * O + K * Np * Np + S * O) * act_bytes + R * 4
    bytes_accessed = (B * C * T * Np * act_bytes + w_bytes
                      + B * O * TNp * act_bytes + B * S * Np * 4)
    cost = pl.CostEstimate(flops=int(flops), transcendentals=int(2 * B * O * TNp),
                           bytes_accessed=int(bytes_accessed))

    io_block = C * T * Np * act_bytes + O * TNp * act_bytes + S * Np * 4  # per-step in+out blocks
    interm_bytes = O * TNp * (24 + 2 * act_bytes)                         # zz/gate/gcn/res/relayouts
    vmem_need = 2 * io_block + 2 * w_bytes + interm_bytes                 # 2x = double buffering
    vmem_limit = int(min(max(vmem_need + (4 << 20), 16 << 20), 56 << 20))  # stay under v7x 64 MiB

    out_flat, skip_p = pl.pallas_call(
        kernel,
        grid=(B,),
        out_shape=(jax.ShapeDtypeStruct((B, O, TNp), mxu_dtype),
                   jax.ShapeDtypeStruct((B, S, Np), f32)),
        in_specs=[
            pl.BlockSpec((None, C, T * Np), lambda b: (b, 0, 0)),   # x      (per batch)
            pl.BlockSpec((2 * O, C), lambda b: (0, 0)),             # wa     (resident)
            pl.BlockSpec((2 * O, C), lambda b: (0, 0)),             # wb
            pl.BlockSpec((K, O, O), lambda b: (0, 0, 0)),           # gwT
            pl.BlockSpec((K, Np, Np), lambda b: (0, 0, 0)),         # supT
            pl.BlockSpec((S, O), lambda b: (0, 0)),                 # wsk
            pl.BlockSpec((R, 1), lambda b: (0, 0)),                 # packed vectors
        ],
        out_specs=(pl.BlockSpec((None, O, TNp), lambda b: (b, 0, 0)),
                   pl.BlockSpec((None, S, Np), lambda b: (b, 0, 0))),
        compiler_params=pltpu.CompilerParams(
            dimension_semantics=("parallel",),
            vmem_limit_bytes=vmem_limit),
        cost_estimate=cost,
    )(x_p, wa, wb, gwT, supT, wsk, vec)

    # glue back to the module's NCHW layouts (outside the kernel; for a stacked
    # network this conversion would be done once, not per layer).
    out = out_flat.reshape(B, O, To, Np)[..., :N]        # (B, O, To, N)
    gate_out = jnp.transpose(out, (0, 1, 3, 2))          # (B, O, N, To)
    skip_out = skip_p[..., :N]                           # (B, S, N)
    return gate_out, skip_out


def reference_forward(x, supports, params, *, dilation):
    """Pure-JAX reference mirroring the PyTorch forward (eval mode)."""
    To = x.shape[-1] - dilation
    w1a, w1b = params['w1'][:, :, 0, 0], params['w1'][:, :, 0, 1]
    w2a, w2b = params['w2'][:, :, 0, 0], params['w2'][:, :, 0, 1]
    z1 = (jnp.einsum('oc,bcnt->bont', w1a, x[..., :To])
          + jnp.einsum('oc,bcnt->bont', w1b, x[..., dilation:])
          + params['b1'][None, :, None, None])
    z2 = (jnp.einsum('oc,bcnt->bont', w2a, x[..., :To])
          + jnp.einsum('oc,bcnt->bont', w2b, x[..., dilation:])
          + params['b2'][None, :, None, None])
    gate = jnp.tanh(z1) * jax.nn.sigmoid(z2)
    skip = (jnp.einsum('sc,bcn->bsn', params['wskip'][:, :, 0], gate[..., -1])
            + params['bskip'][None, :, None])
    aggr = jnp.einsum('khw,bfwt->bkfht', supports, gate)
    gout = (jnp.einsum('bkfht,kfo->boht', aggr, params['gw'])
            + params['gb'][None, :, None, None])
    y = gout + x[..., dilation:]
    eps = 1e-5
    scale = params['bn_gamma'] / jnp.sqrt(params['bn_var'] + eps)
    shift = params['bn_beta'] - params['bn_mean'] * scale
    out = y * scale[None, :, None, None] + shift[None, :, None, None]
    return out, skip


if __name__ == "__main__":
    # small shapes consistent with the module (input_size == output_size for the residual)
    B, C, N, T = 2, 8, 8, 16       # batch, channels, nodes (H), time (W)
    O, S, K, dilation = 8, 8, 3, 2

    key = jax.random.PRNGKey(0)
    ks = jax.random.split(key, 13)
    params = {
        'w1': 0.3 * jax.random.normal(ks[0], (O, C, 1, 2), jnp.float32),
        'b1': 0.1 * jax.random.normal(ks[1], (O,), jnp.float32),
        'w2': 0.3 * jax.random.normal(ks[2], (O, C, 1, 2), jnp.float32),
        'b2': 0.1 * jax.random.normal(ks[3], (O,), jnp.float32),
        'gw': 0.5 * jax.random.normal(ks[4], (K, O, O), jnp.float32),
        'gb': 0.05 * jax.random.normal(ks[5], (O,), jnp.float32),
        'wskip': 0.3 * jax.random.normal(ks[6], (S, O, 1), jnp.float32),
        'bskip': 0.1 * jax.random.normal(ks[7], (S,), jnp.float32),
        'bn_gamma': 1.0 + 0.1 * jax.random.normal(ks[8], (O,), jnp.float32),
        'bn_beta': 0.1 * jax.random.normal(ks[9], (O,), jnp.float32),
        'bn_mean': 0.1 * jax.random.normal(ks[10], (O,), jnp.float32),
        'bn_var': 0.9 * jnp.ones((O,), jnp.float32),
    }
    x = jax.random.normal(ks[11], (B, C, N, T), jnp.float32)
    supports = 0.3 * jax.random.normal(ks[12], (K, N, N), jnp.float32)

    ref_gate, ref_skip = reference_forward(x, supports, params, dilation=dilation)

    # 1) f32 run: strict check of layout / indexing against the f32 reference.
    fwd_f32 = jax.jit(functools.partial(st_layer_forward, dilation=dilation,
                                        mxu_dtype=jnp.float32))
    g32, s32 = fwd_f32(x, supports, params)
    jax.block_until_ready((g32, s32))
    assert g32.shape == (B, O, N, T - dilation)
    assert s32.shape == (B, S, N)
    assert jnp.allclose(g32, ref_gate, atol=1e-4, rtol=1e-3)
    assert jnp.allclose(s32, ref_skip, atol=1e-4, rtol=1e-3)

    # 2) bf16 streaming run (production path): looser tolerance vs the f32 reference.
    fwd_bf16 = jax.jit(functools.partial(st_layer_forward, dilation=dilation,
                                         mxu_dtype=jnp.bfloat16))
    gbf, sbf = fwd_bf16(x, supports, params)
    jax.block_until_ready((gbf, sbf))
    assert jnp.allclose(gbf.astype(jnp.float32), ref_gate, atol=1e-1, rtol=1e-1)
    assert jnp.allclose(sbf, ref_skip, atol=1e-1, rtol=1e-1)

    print("KERNEL_OK")
</pallas_src>

<mosaic_0001>
module attributes {stable_mosaic.version = 11 : i64} {
  func.func @st_layer_kernel(%arg0: i32, %arg1: memref<1x8x2048xf32, #tpu.memory_space<vmem>>, %arg2: memref<16x8xf32, #tpu.memory_space<vmem>>, %arg3: memref<16x8xf32, #tpu.memory_space<vmem>>, %arg4: memref<3x8x8xf32, #tpu.memory_space<vmem>>, %arg5: memref<3x128x128xf32, #tpu.memory_space<vmem>>, %arg6: memref<8x8xf32, #tpu.memory_space<vmem>>, %arg7: memref<40x1xf32, #tpu.memory_space<vmem>>, %arg8: memref<1x8x1792xf32, #tpu.memory_space<vmem>>, %arg9: memref<1x8x128xf32, #tpu.memory_space<vmem>>) attributes {dimension_semantics = [#tpu.dimension_semantics<parallel>], iteration_bounds = array<i64: 2>, scalar_prefetch = 0 : i64, scratch_operands = 0 : i64, tpu.core_type = #tpu.core_type<tc>, window_params = [{transform_indices = @transform_0, window_bounds = array<i64: 1, 8, 2048>}, {pipeline_mode = #tpu.pipeline_mode<synchronous>, transform_indices = @transform_1, window_bounds = array<i64: 16, 8>}, {pipeline_mode = #tpu.pipeline_mode<synchronous>, transform_indices = @transform_2, window_bounds = array<i64: 16, 8>}, {pipeline_mode = #tpu.pipeline_mode<synchronous>, transform_indices = @transform_3, window_bounds = array<i64: 3, 8, 8>}, {pipeline_mode = #tpu.pipeline_mode<synchronous>, transform_indices = @transform_4, window_bounds = array<i64: 3, 128, 128>}, {pipeline_mode = #tpu.pipeline_mode<synchronous>, transform_indices = @transform_5, window_bounds = array<i64: 8, 8>}, {pipeline_mode = #tpu.pipeline_mode<synchronous>, transform_indices = @transform_6, window_bounds = array<i64: 40, 1>}, {transform_indices = @transform_7, window_bounds = array<i64: 1, 8, 1792>}, {transform_indices = @transform_8, window_bounds = array<i64: 1, 8, 128>}]} {
    %c0 = arith.constant 0 : index
    %c0_0 = arith.constant 0 : index
    %c0_1 = arith.constant 0 : index
    %0 = vector.load %arg1[%c0, %c0_0, %c0_1] : memref<1x8x2048xf32, #tpu.memory_space<vmem>>, vector<1x8x1792xf32>
    %1 = vector.shape_cast %0 : vector<1x8x1792xf32> to vector<8x1792xf32>
    %c0_2 = arith.constant 0 : index
    %c0_3 = arith.constant 0 : index
    %c256 = arith.constant 256 : index
    %2 = vector.load %arg1[%c0_2, %c0_3, %c256] : memref<1x8x2048xf32, #tpu.memory_space<vmem>>, vector<1x8x1792xf32>
    %3 = vector.shape_cast %2 : vector<1x8x1792xf32> to vector<8x1792xf32>
    %c0_4 = arith.constant 0 : index
    %c0_5 = arith.constant 0 : index
    %4 = vector.load %arg2[%c0_4, %c0_5] : memref<16x8xf32, #tpu.memory_space<vmem>>, vector<16x8xf32>
    %cst = arith.constant dense<0.000000e+00> : vector<16x1792xf32>
    %5 = tpu.matmul %4, %1, %cst {dimension_numbers = #tpu.dot_dimension_numbers<[1], [0], [0], [1], [0, 0, 1, 1], [], []>} : vector<16x8xf32>, vector<8x1792xf32>, vector<16x1792xf32> -> vector<16x1792xf32>
    %c0_6 = arith.constant 0 : index
    %c0_7 = arith.constant 0 : index
    %6 = vector.load %arg3[%c0_6, %c0_7] : memref<16x8xf32, #tpu.memory_space<vmem>>, vector<16x8xf32>
    %cst_8 = arith.constant dense<0.000000e+00> : vector<16x1792xf32>
    %7 = tpu.matmul %6, %3, %cst_8 {dimension_numbers = #tpu.dot_dimension_numbers<[1], [0], [0], [1], [0, 0, 1, 1], [], []>} : vector<16x8xf32>, vector<8x1792xf32>, vector<16x1792xf32> -> vector<16x1792xf32>
    %8 = arith.addf %5, %7 : vector<16x1792xf32>
    %c0_9 = arith.constant 0 : index
    %c0_10 = arith.constant 0 : index
    %9 = vector.load %arg7[%c0_9, %c0_10] : memref<40x1xf32, #tpu.memory_space<vmem>>, vector<16x1xf32>
    %10 = vector.broadcast %9 : vector<16x1xf32> to vector<16x1792xf32>
    %11 = arith.addf %8, %10 : vector<16x1792xf32>
    %12 = vector.extract_strided_slice %11 {offsets = [0, 0], sizes = [8, 1792], strides = [1, 1]} : vector<16x1792xf32> to vector<8x1792xf32>
    %13 = math.tanh %12 : vector<8x1792xf32>
    %14 = vector.extract_strided_slice %11 {offsets = [8, 0], sizes = [8, 1792], strides = [1, 1]} : vector<16x1792xf32> to vector<8x1792xf32>
    %cst_11 = arith.constant 5.000000e-01 : f32
    %15 = vector.broadcast %cst_11 : f32 to vector<8x1792xf32>
    %16 = arith.mulf %15, %14 : vector<8x1792xf32>
    %17 = math.tanh %16 : vector<8x1792xf32>
    %cst_12 = arith.constant 1.000000e+00 : f32
    %18 = vector.broadcast %cst_12 : f32 to vector<8x1792xf32>
    %19 = arith.addf %17, %18 : vector<8x1792xf32>
    %cst_13 = arith.constant 5.000000e-01 : f32
    %20 = vector.broadcast %cst_13 : f32 to vector<8x1792xf32>
    %21 = arith.mulf %20, %19 : vector<8x1792xf32>
    %22 = arith.mulf %13, %21 : vector<8x1792xf32>
    %23 = vector.extract_strided_slice %22 {offsets = [0, 1664], sizes = [8, 128], strides = [1, 1]} : vector<8x1792xf32> to vector<8x128xf32>
    %c0_14 = arith.constant 0 : index
    %c0_15 = arith.constant 0 : index
    %24 = vector.load %arg6[%c0_14, %c0_15] : memref<8x8xf32, #tpu.memory_space<vmem>>, vector<8x8xf32>
    %cst_16 = arith.constant dense<0.000000e+00> : vector<8x128xf32>
    %25 = tpu.matmul %24, %23, %cst_16 {dimension_numbers = #tpu.dot_dimension_numbers<[1], [0], [0], [1], [0, 0, 1, 1], [], []>} : vector<8x8xf32>, vector<8x128xf32>, vector<8x128xf32> -> vector<8x128xf32>
    %c16 = arith.constant 16 : index
    %c0_17 = arith.constant 0 : index
    %26 = vector.load %arg7[%c16, %c0_17] : memref<40x1xf32, #tpu.memory_space<vmem>>, vector<8x1xf32>
    %27 = vector.broadcast %26 : vector<8x1xf32> to vector<8x128xf32>
    %28 = arith.addf %25, %27 : vector<8x128xf32>
    %c0_18 = arith.constant 0 : index
    %c0_19 = arith.constant 0 : index
    %c0_20 = arith.constant 0 : index
    %29 = vector.load %arg9[%c0_18, %c0_19, %c0_20] : memref<1x8x128xf32, #tpu.memory_space<vmem>>, vector<1x8x128xf32>
    %30 = vector.shape_cast %29 : vector<1x8x128xf32> to vector<8x128xf32>
    %31 = vector.shape_cast %28 : vector<8x128xf32> to vector<1x8x128xf32>
    tpu.vector_store %arg9[%c0_18, %c0_19, %c0_20], %31 {strides = array<i32>} : memref<1x8x128xf32, #tpu.memory_space<vmem>>, vector<1x8x128xf32>,
    %32 = vector.extract_strided_slice %22 {offsets = [0, 0], sizes = [8, 128], strides = [1, 1]} : vector<8x1792xf32> to vector<8x128xf32>
    %33 = vector.extract_strided_slice %22 {offsets = [0, 128], sizes = [8, 128], strides = [1, 1]} : vector<8x1792xf32> to vector<8x128xf32>
    %34 = vector.extract_strided_slice %22 {offsets = [0, 256], sizes = [8, 128], strides = [1, 1]} : vector<8x1792xf32> to vector<8x128xf32>
    %35 = vector.extract_strided_slice %22 {offsets = [0, 384], sizes = [8, 128], strides = [1, 1]} : vector<8x1792xf32> to vector<8x128xf32>
    %36 = vector.extract_strided_slice %22 {offsets = [0, 512], sizes = [8, 128], strides = [1, 1]} : vector<8x1792xf32> to vector<8x128xf32>
    %37 = vector.extract_strided_slice %22 {offsets = [0, 640], sizes = [8, 128], strides = [1, 1]} : vector<8x1792xf32> to vector<8x128xf32>
    %38 = vector.extract_strided_slice %22 {offsets = [0, 768], sizes = [8, 128], strides = [1, 1]} : vector<8x1792xf32> to vector<8x128xf32>
    %39 = vector.extract_strided_slice %22 {offsets = [0, 896], sizes = [8, 128], strides = [1, 1]} : vector<8x1792xf32> to vector<8x128xf32>
    %40 = vector.extract_strided_slice %22 {offsets = [0, 1024], sizes = [8, 128], strides = [1, 1]} : vector<8x1792xf32> to vector<8x128xf32>
    %41 = vector.extract_strided_slice %22 {offsets = [0, 1152], sizes = [8, 128], strides = [1, 1]} : vector<8x1792xf32> to vector<8x128xf32>
    %42 = vector.extract_strided_slice %22 {offsets = [0, 1280], sizes = [8, 128], strides = [1, 1]} : vector<8x1792xf32> to vector<8x128xf32>
    %43 = vector.extract_strided_slice %22 {offsets = [0, 1408], sizes = [8, 128], strides = [1, 1]} : vector<8x1792xf32> to vector<8x128xf32>
    %44 = vector.extract_strided_slice %22 {offsets = [0, 1536], sizes = [8, 128], strides = [1, 1]} : vector<8x1792xf32> to vector<8x128xf32>
    %45 = vector.extract_strided_slice %22 {offsets = [0, 1664], sizes = [8, 128], strides = [1, 1]} : vector<8x1792xf32> to vector<8x128xf32>
    %46 = tpu.concatenate %32, %33, %34, %35, %36, %37, %38, %39, %40, %41, %42, %43, %44, %45 in 0 : vector<8x128xf32>, vector<8x128xf32>, vector<8x128xf32>, vector<8x128xf32>, vector<8x128xf32>, vector<8x128xf32>, vector<8x128xf32>, vector<8x128xf32>, vector<8x128xf32>, vector<8x128xf32>, vector<8x128xf32>, vector<8x128xf32>, vector<8x128xf32>, vector<8x128xf32> -> vector<112x128xf32>
    %c0_21 = arith.constant 0 : index
    %c0_22 = arith.constant 0 : index
    %c0_23 = arith.constant 0 : index
    %47 = vector.load %arg5[%c0_21, %c0_22, %c0_23] : memref<3x128x128xf32, #tpu.memory_space<vmem>>, vector<1x128x128xf32>
    %48 = vector.shape_cast %47 : vector<1x128x128xf32> to vector<128x128xf32>
    %cst_24 = arith.constant dense<0.000000e+00> : vector<112x128xf32>
    %49 = tpu.matmul %46, %48, %cst_24 {dimension_numbers = #tpu.dot_dimension_numbers<[1], [0], [0], [1], [0, 0, 1, 1], [], []>} : vector<112x128xf32>, vector<128x128xf32>, vector<112x128xf32> -> vector<112x128xf32>
    %50 = vector.extract_strided_slice %49 {offsets = [0, 0], sizes = [8, 128], strides = [1, 1]} : vector<112x128xf32> to vector<8x128xf32>
    %51 = vector.extract_strided_slice %49 {offsets = [8, 0], sizes = [8, 128], strides = [1, 1]} : vector<112x128xf32> to vector<8x128xf32>
    %52 = vector.extract_strided_slice %49 {offsets = [16, 0], sizes = [8, 128], strides = [1, 1]} : vector<112x128xf32> to vector<8x128xf32>
    %53 = vector.extract_strided_slice %49 {offsets = [24, 0], sizes = [8, 128], strides = [1, 1]} : vector<112x128xf32> to vector<8x128xf32>
    %54 = vector.extract_strided_slice %49 {offsets = [32, 0], sizes = [8, 128], strides = [1, 1]} : vector<112x128xf32> to vector<8x128xf32>
    %55 = vector.extract_strided_slice %49 {offsets = [40, 0], sizes = [8, 128], strides = [1, 1]} : vector<112x128xf32> to vector<8x128xf32>
    %56 = vector.extract_strided_slice %49 {offsets = [48, 0], sizes = [8, 128], strides = [1, 1]} : vector<112x128xf32> to vector<8x128xf32>
    %57 = vector.extract_strided_slice %49 {offsets = [56, 0], sizes = [8, 128], strides = [1, 1]} : vector<112x128xf32> to vector<8x128xf32>
    %58 = vector.extract_strided_slice %49 {offsets = [64, 0], sizes = [8, 128], strides = [1, 1]} : vector<112x128xf32> to vector<8x128xf32>
    %59 = vector.extract_strided_slice %49 {offsets = [72, 0], sizes = [8, 128], strides = [1, 1]} : vector<112x128xf32> to vector<8x128xf32>
    %60 = vector.extract_strided_slice %49 {offsets = [80, 0], sizes = [8, 128], strides = [1, 1]} : vector<112x128xf32> to vector<8x128xf32>
    %61 = vector.extract_strided_slice %49 {offsets = [88, 0], sizes = [8, 128], strides = [1, 1]} : vector<112x128xf32> to vector<8x128xf32>
    %62 = vector.extract_strided_slice %49 {offsets = [96, 0], sizes = [8, 128], strides = [1, 1]} : vector<112x128xf32> to vector<8x128xf32>
    %63 = vector.extract_strided_slice %49 {offsets = [104, 0], sizes = [8, 128], strides = [1, 1]} : vector<112x128xf32> to vector<8x128xf32>
    %64 = tpu.concatenate %50, %51, %52, %53, %54, %55, %56, %57, %58, %59, %60, %61, %62, %63 in 1 : vector<8x128xf32>, vector<8x128xf32>, vector<8x128xf32>, vector<8x128xf32>, vector<8x128xf32>, vector<8x128xf32>, vector<8x128xf32>, vector<8x128xf32>, vector<8x128xf32>, vector<8x128xf32>, vector<8x128xf32>, vector<8x128xf32>, vector<8x128xf32>, vector<8x128xf32> -> vector<8x1792xf32>
    %c0_25 = arith.constant 0 : index
    %c0_26 = arith.constant 0 : index
    %c0_27 = arith.constant 0 : index
    %65 = vector.load %arg4[%c0_25, %c0_26, %c0_27] : memref<3x8x8xf32, #tpu.memory_space<vmem>>, vector<1x8x8xf32>
    %66 = vector.shape_cast %65 : vector<1x8x8xf32> to vector<8x8xf32>
    %cst_28 = arith.constant dense<0.000000e+00> : vector<8x1792xf32>
    %67 = tpu.matmul %66, %64, %cst_28 {dimension_numbers = #tpu.dot_dimension_numbers<[1], [0], [0], [1], [0, 0, 1, 1], [], []>} : vector<8x8xf32>, vector<8x1792xf32>, vector<8x1792xf32> -> vector<8x1792xf32>
    %c1 = arith.constant 1 : index
    %c0_29 = arith.constant 0 : index
    %c0_30 = arith.constant 0 : index
    %68 = vector.load %arg5[%c1, %c0_29, %c0_30] : memref<3x128x128xf32, #tpu.memory_space<vmem>>, vector<1x128x128xf32>
    %69 = vector.shape_cast %68 : vector<1x128x128xf32> to vector<128x128xf32>
    %cst_31 = arith.constant dense<0.000000e+00> : vector<112x128xf32>
    %70 = tpu.matmul %46, %69, %cst_31 {dimension_numbers = #tpu.dot_dimension_numbers<[1], [0], [0], [1], [0, 0, 1, 1], [], []>} : vector<112x128xf32>, vector<128x128xf32>, vector<112x128xf32> -> vector<112x128xf32>
    %71 = vector.extract_strided_slice %70 {offsets = [0, 0], sizes = [8, 128], strides = [1, 1]} : vector<112x128xf32> to vector<8x128xf32>
    %72 = vector.extract_strided_slice %70 {offsets = [8, 0], sizes = [8, 128], strides = [1, 1]} : vector<112x128xf32> to vector<8x128xf32>
    %73 = vector.extract_strided_slice %70 {offsets = [16, 0], sizes = [8, 128], strides = [1, 1]} : vector<112x128xf32> to vector<8x128xf32>
    %74 = vector.extract_strided_slice %70 {offsets = [24, 0], sizes = [8, 128], strides = [1, 1]} : vector<112x128xf32> to vector<8x128xf32>
    %75 = vector.extract_strided_slice %70 {offsets = [32, 0], sizes = [8, 128], strides = [1, 1]} : vector<112x128xf32> to vector<8x128xf32>
    %76 = vector.extract_strided_slice %70 {offsets = [40, 0], sizes = [8, 128], strides = [1, 1]} : vector<112x128xf32> to vector<8x128xf32>
    %77 = vector.extract_strided_slice %70 {offsets = [48, 0], sizes = [8, 128], strides = [1, 1]} : vector<112x128xf32> to vector<8x128xf32>
    %78 = vector.extract_strided_slice %70 {offsets = [56, 0], sizes = [8, 128], strides = [1, 1]} : vector<112x128xf32> to vector<8x128xf32>
    %79 = vector.extract_strided_slice %70 {offsets = [64, 0], sizes = [8, 128], strides = [1, 1]} : vector<112x128xf32> to vector<8x128xf32>
    %80 = vector.extract_strided_slice %70 {offsets = [72, 0], sizes = [8, 128], strides = [1, 1]} : vector<112x128xf32> to vector<8x128xf32>
    %81 = vector.extract_strided_slice %70 {offsets = [80, 0], sizes = [8, 128], strides = [1, 1]} : vector<112x128xf32> to vector<8x128xf32>
    %82 = vector.extract_strided_slice %70 {offsets = [88, 0], sizes = [8, 128], strides = [1, 1]} : vector<112x128xf32> to vector<8x128xf32>
    %83 = vector.extract_strided_slice %70 {offsets = [96, 0], sizes = [8, 128], strides = [1, 1]} : vector<112x128xf32> to vector<8x128xf32>
    %84 = vector.extract_strided_slice %70 {offsets = [104, 0], sizes = [8, 128], strides = [1, 1]} : vector<112x128xf32> to vector<8x128xf32>
    %85 = tpu.concatenate %71, %72, %73, %74, %75, %76, %77, %78, %79, %80, %81, %82, %83, %84 in 1 : vector<8x128xf32>, vector<8x128xf32>, vector<8x128xf32>, vector<8x128xf32>, vector<8x128xf32>, vector<8x128xf32>, vector<8x128xf32>, vector<8x128xf32>, vector<8x128xf32>, vector<8x128xf32>, vector<8x128xf32>, vector<8x128xf32>, vector<8x128xf32>, vector<8x128xf32> -> vector<8x1792xf32>
    %c1_32 = arith.constant 1 : index
    %c0_33 = arith.constant 0 : index
    %c0_34 = arith.constant 0 : index
    %86 = vector.load %arg4[%c1_32, %c0_33, %c0_34] : memref<3x8x8xf32, #tpu.memory_space<vmem>>, vector<1x8x8xf32>
    %87 = vector.shape_cast %86 : vector<1x8x8xf32> to vector<8x8xf32>
    %cst_35 = arith.constant dense<0.000000e+00> : vector<8x1792xf32>
    %88 = tpu.matmul %87, %85, %cst_35 {dimension_numbers = #tpu.dot_dimension_numbers<[1], [0], [0], [1], [0, 0, 1, 1], [], []>} : vector<8x8xf32>, vector<8x1792xf32>, vector<8x1792xf32> -> vector<8x1792xf32>
    %89 = arith.addf %67, %88 : vector<8x1792xf32>
    %c2 = arith.constant 2 : index
    %c0_36 = arith.constant 0 : index
    %c0_37 = arith.constant 0 : index
    %90 = vector.load %arg5[%c2, %c0_36, %c0_37] : memref<3x128x128xf32, #tpu.memory_space<vmem>>, vector<1x128x128xf32>
    %91 = vector.shape_cast %90 : vector<1x128x128xf32> to vector<128x128xf32>
    %cst_38 = arith.constant dense<0.000000e+00> : vector<112x128xf32>
    %92 = tpu.matmul %46, %91, %cst_38 {dimension_numbers = #tpu.dot_dimension_numbers<[1], [0], [0], [1], [0, 0, 1, 1], [], []>} : vector<112x128xf32>, vector<128x128xf32>, vector<112x128xf32> -> vector<112x128xf32>
    %93 = vector.extract_strided_slice %92 {offsets = [0, 0], sizes = [8, 128], strides = [1, 1]} : vector<112x128xf32> to vector<8x128xf32>
    %94 = vector.extract_strided_slice %92 {offsets = [8, 0], sizes = [8, 128], strides = [1, 1]} : vector<112x128xf32> to vector<8x128xf32>
    %95 = vector.extract_strided_slice %92 {offsets = [16, 0], sizes = [8, 128], strides = [1, 1]} : vector<112x128xf32> to vector<8x128xf32>
    %96 = vector.extract_strided_slice %92 {offsets = [24, 0], sizes = [8, 128], strides = [1, 1]} : vector<112x128xf32> to vector<8x128xf32>
    %97 = vector.extract_strided_slice %92 {offsets = [32, 0], sizes = [8, 128], strides = [1, 1]} : vector<112x128xf32> to vector<8x128xf32>
    %98 = vector.extract_strided_slice %92 {offsets = [40, 0], sizes = [8, 128], strides = [1, 1]} : vector<112x128xf32> to vector<8x128xf32>
    %99 = vector.extract_strided_slice %92 {offsets = [48, 0], sizes = [8, 128], strides = [1, 1]} : vector<112x128xf32> to vector<8x128xf32>
    %100 = vector.extract_strided_slice %92 {offsets = [56, 0], sizes = [8, 128], strides = [1, 1]} : vector<112x128xf32> to vector<8x128xf32>
    %101 = vector.extract_strided_slice %92 {offsets = [64, 0], sizes = [8, 128], strides = [1, 1]} : vector<112x128xf32> to vector<8x128xf32>
    %102 = vector.extract_strided_slice %92 {offsets = [72, 0], sizes = [8, 128], strides = [1, 1]} : vector<112x128xf32> to vector<8x128xf32>
    %103 = vector.extract_strided_slice %92 {offsets = [80, 0], sizes = [8, 128], strides = [1, 1]} : vector<112x128xf32> to vector<8x128xf32>
    %104 = vector.extract_strided_slice %92 {offsets = [88, 0], sizes = [8, 128], strides = [1, 1]} : vector<112x128xf32> to vector<8x128xf32>
    %105 = vector.extract_strided_slice %92 {offsets = [96, 0], sizes = [8, 128], strides = [1, 1]} : vector<112x128xf32> to vector<8x128xf32>
    %106 = vector.extract_strided_slice %92 {offsets = [104, 0], sizes = [8, 128], strides = [1, 1]} : vector<112x128xf32> to vector<8x128xf32>
    %107 = tpu.concatenate %93, %94, %95, %96, %97, %98, %99, %100, %101, %102, %103, %104, %105, %106 in 1 : vector<8x128xf32>, vector<8x128xf32>, vector<8x128xf32>, vector<8x128xf32>, vector<8x128xf32>, vector<8x128xf32>, vector<8x128xf32>, vector<8x128xf32>, vector<8x128xf32>, vector<8x128xf32>, vector<8x128xf32>, vector<8x128xf32>, vector<8x128xf32>, vector<8x128xf32> -> vector<8x1792xf32>
    %c2_39 = arith.constant 2 : index
    %c0_40 = arith.constant 0 : index
    %c0_41 = arith.constant 0 : index
    %108 = vector.load %arg4[%c2_39, %c0_40, %c0_41] : memref<3x8x8xf32, #tpu.memory_space<vmem>>, vector<1x8x8xf32>
    %109 = vector.shape_cast %108 : vector<1x8x8xf32> to vector<8x8xf32>
    %cst_42 = arith.constant dense<0.000000e+00> : vector<8x1792xf32>
    %110 = tpu.matmul %109, %107, %cst_42 {dimension_numbers = #tpu.dot_dimension_numbers<[1], [0], [0], [1], [0, 0, 1, 1], [], []>} : vector<8x8xf32>, vector<8x1792xf32>, vector<8x1792xf32> -> vector<8x1792xf32>
    %111 = arith.addf %89, %110 : vector<8x1792xf32>
    %c0_43 = arith.constant 0 : index
    %c0_44 = arith.constant 0 : index
    %c256_45 = arith.constant 256 : index
    %112 = vector.load %arg1[%c0_43, %c0_44, %c256_45] : memref<1x8x2048xf32, #tpu.memory_space<vmem>>, vector<1x8x1792xf32>
    %113 = vector.shape_cast %112 : vector<1x8x1792xf32> to vector<8x1792xf32>
    %c24 = arith.constant 24 : index
    %c0_46 = arith.constant 0 : index
    %114 = vector.load %arg7[%c24, %c0_46] : memref<40x1xf32, #tpu.memory_space<vmem>>, vector<8x1xf32>
    %c32 = arith.constant 32 : index
    %c0_47 = arith.constant 0 : index
    %115 = vector.load %arg7[%c32, %c0_47] : memref<40x1xf32, #tpu.memory_space<vmem>>, vector<8x1xf32>
    %116 = arith.addf %111, %113 : vector<8x1792xf32>
    %117 = vector.broadcast %114 : vector<8x1xf32> to vector<8x1792xf32>
    %118 = arith.mulf %116, %117 : vector<8x1792xf32>
    %119 = vector.broadcast %115 : vector<8x1xf32> to vector<8x1792xf32>
    %120 = arith.addf %118, %119 : vector<8x1792xf32>
    %c0_48 = arith.constant 0 : index
    %c0_49 = arith.constant 0 : index
    %c0_50 = arith.constant 0 : index
    %121 = vector.load %arg8[%c0_48, %c0_49, %c0_50] : memref<1x8x1792xf32, #tpu.memory_space<vmem>>, vector<1x8x1792xf32>
    %122 = vector.shape_cast %121 : vector<1x8x1792xf32> to vector<8x1792xf32>
    %123 = vector.shape_cast %120 : vector<8x1792xf32> to vector<1x8x1792xf32>
    tpu.vector_store %arg8[%c0_48, %c0_49, %c0_50], %123 {strides = array<i32>} : memref<1x8x1792xf32, #tpu.memory_space<vmem>>, vector<1x8x1792xf32>,
    return
  }
  func.func @transform_0(%arg0: i32) -> (i32, i32, i32) {
    %c0_i32 = arith.constant 0 : i32
    %c0_i32_0 = arith.constant 0 : i32
    %c0_i32_1 = arith.constant 0 : i32
    return %arg0, %c0_i32, %c0_i32_0 : i32, i32, i32
  }
  func.func @transform_1(%arg0: i32) -> (i32, i32) {
    %c0_i32 = arith.constant 0 : i32
    %c0_i32_0 = arith.constant 0 : i32
    %c0_i32_1 = arith.constant 0 : i32
    return %c0_i32, %c0_i32_0 : i32, i32
  }
  func.func @transform_2(%arg0: i32) -> (i32, i32) {
    %c0_i32 = arith.constant 0 : i32
    %c0_i32_0 = arith.constant 0 : i32
    %c0_i32_1 = arith.constant 0 : i32
    return %c0_i32, %c0_i32_0 : i32, i32
  }
  func.func @transform_3(%arg0: i32) -> (i32, i32, i32) {
    %c0_i32 = arith.constant 0 : i32
    %c0_i32_0 = arith.constant 0 : i32
    %c0_i32_1 = arith.constant 0 : i32
    %c0_i32_2 = arith.constant 0 : i32
    return %c0_i32, %c0_i32_0, %c0_i32_1 : i32, i32, i32
  }
  func.func @transform_4(%arg0: i32) -> (i32, i32, i32) {
    %c0_i32 = arith.constant 0 : i32
    %c0_i32_0 = arith.constant 0 : i32
    %c0_i32_1 = arith.constant 0 : i32
    %c0_i32_2 = arith.constant 0 : i32
    return %c0_i32, %c0_i32_0, %c0_i32_1 : i32, i32, i32
  }
  func.func @transform_5(%arg0: i32) -> (i32, i32) {
    %c0_i32 = arith.constant 0 : i32
    %c0_i32_0 = arith.constant 0 : i32
    %c0_i32_1 = arith.constant 0 : i32
    return %c0_i32, %c0_i32_0 : i32, i32
  }
  func.func @transform_6(%arg0: i32) -> (i32, i32) {
    %c0_i32 = arith.constant 0 : i32
    %c0_i32_0 = arith.constant 0 : i32
    %c0_i32_1 = arith.constant 0 : i32
    return %c0_i32, %c0_i32_0 : i32, i32
  }
  func.func @transform_7(%arg0: i32) -> (i32, i32, i32) {
    %c0_i32 = arith.constant 0 : i32
    %c0_i32_0 = arith.constant 0 : i32
    %c0_i32_1 = arith.constant 0 : i32
    return %arg0, %c0_i32, %c0_i32_0 : i32, i32, i32
  }
  func.func @transform_8(%arg0: i32) -> (i32, i32, i32) {
    %c0_i32 = arith.constant 0 : i32
    %c0_i32_0 = arith.constant 0 : i32
    %c0_i32_1 = arith.constant 0 : i32
    return %arg0, %c0_i32, %c0_i32_0 : i32, i32, i32
  }
}

</mosaic_0001>

<bundles_post_ra>
// kernel: st_layer_forward.1
= control target key start
LH: loop header
LB: loop body
LE: loop exit
PB: predicated region body
PF: predicated region fallthrough
CT: control target
= control target key end

     0   :  { %s5184_s0 = inlined_call_operand.vmem [shape: f32[2,8,2048], index: 0, kind: input, shape index: {}]   ;;  %s5185_s1 = inlined_call_operand.vmem [shape: f32[16,8], index: 1, kind: input, shape index: {}]   ;;  %s5186_s2 = inlined_call_operand.vmem [shape: f32[16,8], index: 2, kind: input, shape index: {}]   ;;  %s5187_s3 = inlined_call_operand.vmem [shape: f32[3,8,8], index: 3, kind: input, shape index: {}]   ;;  %s5188_s4 = inlined_call_operand.vmem [shape: f32[3,128,128], index: 4, kind: input, shape index: {}]   ;;  %s5189_s5 = inlined_call_operand.vmem [shape: f32[8,8], index: 5, kind: input, shape index: {}]   ;;  %s5190_s6 = inlined_call_operand.vmem [shape: f32[40,1], index: 6, kind: input, shape index: {}]   ;;  %s5191_s7 = inlined_call_operand.vmem [shape: f32[2,8,1792], index: 7, kind: output, shape index: {0}]   ;;  %s5192_s8 = inlined_call_operand.hbm [shape: f32[2,8,128], index: 8, kind: output, shape index: {1}]  }
   0x1   :  { %5193 = sst [smem:[#allocation5_spill]] %s5184_s0 }
   0x2   :  { %5194 = sst [smem:[#allocation6_spill]] %s5185_s1 }
   0x3   :  { %14 = vsyncpa [#allocation3], 0 }
   0x4   :  { %16 = vsyncpa [#allocation3 + $0x1], 0  ;;  %s4404_s27 = smov 0   ;;  %s4406_s28 = smov 0  }
   0x5   :  { %s4408_s29 = smov 0   ;;  %s4410_s30 = smov 0  }
   0x6 LB: > { %s4425_s9 = sadd.s32 4294967295, %s4353_s30   ;;  %s3807_s10 = sadd.s32 4294967294, %s4353_s30   ;;  %s4353_s30 = sphi %s4410_s30, %s5202_s30   ;;  %s4349_s29 = sphi %s4408_s29, %s5201_s29   ;;  %s4345_s28 = sphi %s4406_s28, %s5200_s28   ;;  %s4341_s27 = sphi %s4404_s27, %s5199_s27  }
   0x7   : > { %s4429_s11 = sadd.s32 1, %s4353_s30   ;;  %s207_s12 = sadd.s32 1, %s4349_s29 }
   0x8   : > { %s204_s13 = ssub.s32 %s4353_s30, %s4429_s11  ;;  %p217_p0 = scmp.ne.s32.totalorder %s4349_s29, %s4345_s28 }
   0x9   : > { %p205_p1 = scmp.eq.s32.totalorder %s204_s13, 0  ;;  %p218_p2 = scmp.eq.s32.totalorder %s4425_s9, 1 }
   0xa   : > { %p223_p3 = scmp.ne.s32.totalorder %s4345_s28, %s4341_s27  ;;  %p224_p4 = scmp.eq.s32.totalorder %s3807_s10, 1 }
   0xb   : > { %s4440_s14 = scalar_select %p205_p1, %s4349_s29, %s207_s12  }
   0xc   : > { %p4442_p5 = por %p218_p2, %p217_p0  ;;  %p4446_p6 = por %p224_p4, %p223_p3 }
   0xd   : > { %p3810_p7 = scmp.ge.s32.totalorder %s4353_s30, 1  ;;  %p268_p8 = scmp.lt.s32.totalorder %s4353_s30, 3 }
   0xf   : > { %p269_p9 = pnand %p3810_p7, %p268_p8 }
  0x10   : > { %p307_p10 = scmp.lt.s32.totalorder (!%p269_p9), %s4425_s9, 1  ;;  %s5197_s0 = sld [smem:[#allocation5_spill]] (!%p269_p9) }
  0x11   : > { %272 = sbr.rel (%p269_p9) target bundleno = 1021 (0x3fd), region = 48  ;;  %s5198_s1 = sld [smem:[#allocation6_spill]] (!%p269_p9) }
  0x12   : > { %s304_s13 = sand.u32 (!%p269_p9), 1, %s4345_s28   ;;  %s3900_s10 = sshll.u32 (!%p269_p9), %s4425_s9, 7 }
  0x13   : > { %s4903_s17 = sshll.u32 (!%p269_p9), %s304_s13, 3  ;;  %s3721_s22 = scalar_lea.hbm (!%p269_p9), %s5192_s8, %s3900_s10 }
  0x14   : > { %s306_s18 = scalar_lea.vmem (!%p269_p9), [#allocation2], %s4903_s17  ;;  %s3707_s24 = scalar_lea.sflag (!%p269_p9), [#allocation3], %s304_s13 }
  0x15   : > { %s3723_s12 = sshll.u32 (!%p269_p9), %s306_s18, 4  ;;  %s4358_s26 = smov (!%p269_p9), [#allocation2]   ;;  %s3724_s12 = int_to_ptr.vmem [resolvable:$true] %s3723_s12 }
  0x16   : > { %v4355_v0 = vmov 0.0   ;;  %v1441_v1 = vld [vmem:[%s5190_s6 + $0x8] sm:$0xff]  ;;  %s4459_s19 = scalar_select %p307_p10, %s4425_s9, 1  ;;  %v4356_v2 = vmov 0   ;;  %v4470_v3 = vld [vmem:[%s5186_s2] sm:$0xff]  ;;  %vm349_vm0 = vcmask 64512  }
  0x17   : > { %420 = vmatprep.mubr.f32.mxu0 %v4355_v0  ;;  %497 = vmatprep.mubr.f32.mxu1 %v4355_v0  ;;  %v348_v12 = vld [vmem:[%s5186_s2 + $0x8] sm:$0xff]  ;;  %v1440_v15 = vld [vmem:[%s5190_s6] sm:$0xff]  ;;  %v1660_v25 = vld [vmem:[%s5188_s4 + $0x78] sm:$0xff]  ;;  %vm4357_vm1 = vmmov 0   ;;  %s4293_s25 = scalar_lea.vmem %s3724_s12, 128 }
  0x18   : > { %4235 = vset.pattern.permute.xlu0 %v4356_v2  ;;  %4236 = vset.pattern.permute.xlu1 %v4356_v2  ;;  %s3903_s20 = sshll.u32 %s4459_s19, 7  ;;  %v3634_v20 = vld [vmem:[%s5190_s6 + $0x20] sm:$0xff]  ;;  %v346_v24 = vld [vmem:[%s5198_s1 + $0x8] sm:$0xff]  ;;  %v1659_v26 = vld [vmem:[%s5188_s4 + $0x70] sm:$0xff]  ;;  %p4294_p11 = scmp.ne.s32.totalorder %s3724_s12, %s4293_s25 }
  0x19   : > { %1449 = vperm.xlu0 %4235, %v1441_v1   ;;  %s4465_s23 = scalar_lea.vmem %s5197_s0, %s3903_s20  ;;  %v345_v23 = vld [vmem:[%s5198_s1] sm:$0xff]  ;;  %v1658_v27 = vld [vmem:[%s5188_s4 + $0x68] sm:$0xff]  ;;  %v1656_v29 = vld [vmem:[%s5188_s4 + $0x58] sm:$0xff]  ;;  %s4297_s0 = sshll.u32 %s4358_s26, 4  ;;  %s4298_s0 = int_to_ptr.vmem [resolvable:$false] %s4297_s0 }
  0x1a   : > { %v332_v4 = vld [vmem:[%s4465_s23 + $0x18] sm:$0xff]  ;;  %v334_v5 = vld [vmem:[%s4465_s23 + $0x28] sm:$0xff]  ;;  %v4475_v6 = vld [vmem:[%s4465_s23 + $0x10] sm:$0xff]  ;;  %p4295_p12 = pnand %p4294_p11, %p4442_p5  ;;  %s4299_s1 = scalar_lea.vmem %s4298_s0, 256 }
  0x1b   : > { %386 = vmatprep.subr.mxu0 %v332_v4  ;;  %463 = vmatprep.subr.mxu1 %v334_v5  ;;  %v4478_v7 = vld [vmem:[%s4465_s23 + $0x20] sm:$0xff]  ;;  %v336_v8 = vld [vmem:[%s4465_s23 + $0x38] sm:$0xff]  ;;  %v338_v9 = vld [vmem:[%s4465_s23 + $0x48] sm:$0xff]  ;;  %p4300_p0 = scmp.lt.s32.totalorder %s3724_s12, %s4298_s0  ;;  %p4301_p1 = scmp.lt.s32.totalorder %s4299_s1, %s4293_s25 }
  0x1c   : > { %387 = vmatpush1.msra.mxu0 %v4475_v6  ;;  %464 = vmatpush1.msra.mxu1 %v4478_v7  ;;  %v4489_v10 = vld [vmem:[%s4465_s23 + $0x30] sm:$0xff]  ;;  %v4492_v11 = vld [vmem:[%s4465_s23 + $0x40] sm:$0xff]  ;;  %v340_v13 = vld [vmem:[%s4465_s23 + $0x58] sm:$0xff]  ;;  %p4296_p13 = pneg %p4295_p12 }
  0x1d   : > { %3815 = vmatmul.mubr.msk.f32.vlgmr.msra.gmra.mxu0 %vm349_vm0, %v4470_v3  ;;  %3817 = vmatmul.mubr.msk.f32.vlgmr.msra.gmra.mxu1 %vm349_vm0, %v4470_v3  ;;  %v342_v14 = vld [vmem:[%s4465_s23 + $0x68] sm:$0xff]  ;;  %v339_v16 = vld [vmem:[%s4465_s23 + $0x50] sm:$0xff]  ;;  %v341_v17 = vld [vmem:[%s4465_s23 + $0x60] sm:$0xff]  ;;  %p4302_p2 = por %p4301_p1, %p4300_p0 }
  0x1e   : > { %426 = vmatprep.mubr.f32.mxu0 %v4355_v0  ;;  %503 = vmatprep.mubr.f32.mxu1 %v4355_v0  ;;  %v344_v18 = vld [vmem:[%s4465_s23 + $0x78] sm:$0xff]  ;;  %v318_v19 = vld [vmem:[%s4465_s23 + $0x8] sm:$0xff]  ;;  %v343_v21 = vld [vmem:[%s4465_s23 + $0x70] sm:$0xff] }
  0x1f   : > { %540 = vmatprep.subr.mxu0 %v336_v8  ;;  %617 = vmatprep.subr.mxu1 %v338_v9  ;;  %v317_v22 = vld [vmem:[%s4465_s23] sm:$0xff]  ;;  %v1655_v30 = vld [vmem:[%s5188_s4 + $0x50] sm:$0xff]  ;;  %v1654_v31 = vld [vmem:[%s5188_s4 + $0x48] sm:$0xff]  ;;  %p4303_p3 = pnand %p4302_p2, %p4296_p13 }
  0x20   : > { %541 = vmatpush1.msra.mxu0 %v4489_v10  ;;  %618 = vmatpush1.msra.mxu1 %v4492_v11  ;;  %v1657_v28 = vld [vmem:[%s5188_s4 + $0x60] sm:$0xff]  ;;  %v1652_v33 = vld [vmem:[%s5188_s4 + $0x38] sm:$0xff]  ;;  %v1651_v34 = vld [vmem:[%s5188_s4 + $0x30] sm:$0xff] }
  0x21   : > { %3816 = vmatmul.mubr.msk.f32.gmra.mxu0 %vm349_vm0, %v348_v12  ;;  %3818 = vmatmul.mubr.msk.f32.gmra.mxu1 %vm349_vm0, %v348_v12  ;;  %v1653_v32 = vld [vmem:[%s5188_s4 + $0x40] sm:$0xff]  ;;  %v1650_v35 = vld [vmem:[%s5188_s4 + $0x28] sm:$0xff]  ;;  %v1648_v37 = vld [vmem:[%s5188_s4 + $0x18] sm:$0xff] }
  0x22   : > { %574 = vmatprep.mubr.f32.mxu0 %v4355_v0  ;;  %651 = vmatprep.mubr.f32.mxu1 %v4355_v0  ;;  %v1649_v36 = vld [vmem:[%s5188_s4 + $0x20] sm:$0xff]  ;;  %v1647_v38 = vld [vmem:[%s5188_s4 + $0x10] sm:$0xff]  ;;  %v1646_v39 = vld [vmem:[%s5188_s4 + $0x8] sm:$0xff] }
  0x23   : > { %694 = vmatprep.subr.mxu0 %v340_v13  ;;  %771 = vmatprep.subr.mxu1 %v342_v14  ;;  %v1645_v40 = vld [vmem:[%s5188_s4] sm:$0xff]  ;;  %v4632_v41 = vld [vmem:[%s5188_s4 + $0xf8] sm:$0xff]  ;;  %v1565_v51 = vld [vmem:[%s5190_s6 + $0x10] sm:$0xff] }
  0x24   : > { %1444 = vperm.xlu0 %4235, %v1440_v15   ;;  %v3633_v48 = vld [vmem:[%s5190_s6 + $0x18] sm:$0xff] }
  0x25   : > { %3819 = vmatmul.mubr.msk.f32.vlgmr.msra.gmra.mxu0 %vm349_vm0, %v4470_v3  ;;  %3821 = vmatmul.mubr.msk.f32.vlgmr.msra.gmra.mxu1 %vm349_vm0, %v4470_v3 }
  0x26   : > { %580 = vmatprep.mubr.f32.mxu0 %v4355_v0  ;;  %657 = vmatprep.mubr.f32.mxu1 %v4355_v0 }
  0x27   : > { %695 = vmatpush1.msra.mxu0 %v339_v16  ;;  %772 = vmatpush1.msra.mxu1 %v341_v17 }
  0x28   : > { %848 = vmatprep.subr.mxu0 %v344_v18  ;;  %931 = vmatprep.subr.mxu1 %v318_v19 }
  0x29   : > { %3820 = vmatmul.mubr.msk.f32.gmra.mxu0 %vm349_vm0, %v348_v12  ;;  %3822 = vmatmul.mubr.msk.f32.gmra.mxu1 %vm349_vm0, %v348_v12 }
  0x2a   : > { %728 = vmatprep.mubr.f32.mxu0 %v4355_v0  ;;  %805 = vmatprep.mubr.f32.mxu1 %v4355_v0 }
  0x2b   : > { %3670 = vperm.xlu0 %4235, %v3634_v20   ;;  %3651 = vperm.xlu1 %4236, %v3633_v48  }
  0x2d   : > { %3823 = vmatmul.mubr.msk.f32.vlgmr.msra.gmra.mxu0 %vm349_vm0, %v4470_v3  ;;  %3825 = vmatmul.mubr.msk.f32.vlgmr.msra.gmra.mxu1 %vm349_vm0, %v4470_v3 }
  0x2e   : > { %734 = vmatprep.mubr.f32.mxu0 %v4355_v0  ;;  %811 = vmatprep.mubr.f32.mxu1 %v4355_v0 }
  0x2f   : > { %849 = vmatpush1.msra.mxu0 %v343_v21  ;;  %932 = vmatpush1.msra.mxu1 %v317_v22 }
  0x30   : > { %1008 = vmatprep.subr.mxu0 %v332_v4  ;;  %1085 = vmatprep.subr.mxu1 %v334_v5 }
  0x31   : > { %3824 = vmatmul.mubr.msk.f32.gmra.mxu0 %vm349_vm0, %v348_v12  ;;  %3826 = vmatmul.mubr.msk.f32.gmra.mxu1 %vm349_vm0, %v348_v12 }
  0x32   : > { %882 = vmatprep.mubr.f32.mxu0 %v4355_v0  ;;  %965 = vmatprep.mubr.f32.mxu1 %v4355_v0 }
  0x33   : > { %1568 = vperm.xlu1 %4236, %v1565_v51  }
  0x35   : > { %3827 = vmatmul.mubr.msk.f32.vlgmr.msra.gmra.mxu0 %vm349_vm0, %v4470_v3  ;;  %3829 = vmatmul.mubr.msk.f32.vlgmr.msra.gmra.mxu1 %vm349_vm0, %v345_v23 }
  0x36   : > { %888 = vmatprep.mubr.f32.mxu0 %v4355_v0  ;;  %971 = vmatprep.mubr.f32.mxu1 %v4355_v0 }
  0x37   : > { %1009 = vmatpush1.msra.mxu0 %v4475_v6  ;;  %1086 = vmatpush1.msra.mxu1 %v4478_v7 }
  0x38   : > { %1162 = vmatprep.subr.mxu0 %v336_v8  ;;  %1239 = vmatprep.subr.mxu1 %v338_v9 }
  0x39   : > { %3828 = vmatmul.mubr.msk.f32.gmra.mxu0 %vm349_vm0, %v348_v12  ;;  %3830 = vmatmul.mubr.msk.f32.gmra.mxu1 %vm349_vm0, %v346_v24 }
  0x3a   : > { %1042 = vmatprep.mubr.f32.mxu0 %v4355_v0  ;;  %1119 = vmatprep.mubr.f32.mxu1 %v4355_v0 }
  0x3d   : > { %3831 = vmatmul.mubr.msk.f32.vlgmr.msra.gmra.mxu0 %vm349_vm0, %v345_v23  ;;  %3833 = vmatmul.mubr.msk.f32.vlgmr.msra.gmra.mxu1 %vm349_vm0, %v345_v23 }
  0x3e   : > { %1048 = vmatprep.mubr.f32.mxu0 %v4355_v0  ;;  %1125 = vmatprep.mubr.f32.mxu1 %v4355_v0 }
  0x3f   : > { %1163 = vmatpush1.msra.mxu0 %v4489_v10  ;;  %1240 = vmatpush1.msra.mxu1 %v4492_v11 }
  0x40   : > { %1316 = vmatprep.subr.mxu0 %v340_v13  ;;  %1393 = vmatprep.subr.mxu1 %v342_v14 }
  0x41   : > { %3832 = vmatmul.mubr.msk.f32.gmra.mxu0 %vm349_vm0, %v346_v24  ;;  %3834 = vmatmul.mubr.msk.f32.gmra.mxu1 %vm349_vm0, %v346_v24 }
  0x42   : > { %1196 = vmatprep.mubr.f32.mxu0 %v4355_v0  ;;  %1273 = vmatprep.mubr.f32.mxu1 %v4355_v0 }
  0x45   : > { %3835 = vmatmul.mubr.msk.f32.vlgmr.msra.gmra.mxu0 %vm349_vm0, %v345_v23  ;;  %3837 = vmatmul.mubr.msk.f32.vlgmr.msra.gmra.mxu1 %vm349_vm0, %v345_v23 }
  0x46   : > { %1202 = vmatprep.mubr.f32.mxu0 %v4355_v0  ;;  %1279 = vmatprep.mubr.f32.mxu1 %v4355_v0 }
  0x47   : > { %1317 = vmatpush1.msra.mxu0 %v339_v16  ;;  %1394 = vmatpush1.msra.mxu1 %v341_v17 }
  0x48   : > { %3996 = vmatprep.subr.mxu0 %v4355_v0  ;;  %4001 = vmatprep.subr.mxu1 %v1660_v25 }
  0x49   : > { %3836 = vmatmul.mubr.msk.f32.gmra.mxu0 %vm349_vm0, %v346_v24  ;;  %3838 = vmatmul.mubr.msk.f32.gmra.mxu1 %vm349_vm0, %v346_v24 }
  0x4a   : > { %1350 = vmatprep.mubr.f32.mxu0 %v4355_v0  ;;  %1427 = vmatprep.mubr.f32.mxu1 %v4355_v0 }
  0x4d   : > { %3839 = vmatmul.mubr.msk.f32.vlgmr.msra.gmra.mxu0 %vm349_vm0, %v345_v23  ;;  %3841 = vmatmul.mubr.msk.f32.vlgmr.msra.gmra.mxu1 %vm349_vm0, %v345_v23 }
  0x4e   : > { %1356 = vmatprep.mubr.f32.mxu0 %v4355_v0  ;;  %1433 = vmatprep.mubr.f32.mxu1 %v4355_v0 }
  0x4f   : > { %4002 = vmatpush3.msra.mxu1 %v1660_v25 }
  0x50   : > { %4003 = vmatprep.subr.mxu1 %v1659_v26 }
  0x51   : > { %3840 = vmatmul.mubr.msk.f32.gmra.mxu0 %vm349_vm0, %v346_v24  ;;  %3842 = vmatmul.mubr.msk.f32.gmra.mxu1 %vm349_vm0, %v346_v24 }
  0x52   : > { %4004 = vmatpush3.msra.mxu1 %v1659_v26  ;;  %3998 = vmatprep.mubr.msk.f32.mxu0 %vm4357_vm1, %v4355_v0 }
  0x53   : > { %4005 = vmatprep.subr.mxu1 %v1658_v27 }
  0x54   : > { %4006 = vmatpush3.msra.mxu1 %v1658_v27 }
  0x55   : > { %4007 = vmatprep.subr.mxu1 %v1657_v28 }
  0x56   : > { %4008 = vmatpush3.msra.mxu1 %v1657_v28 }
  0x57   : > { %4009 = vmatprep.subr.mxu1 %v1656_v29 }
  0x58   : > { %4010 = vmatpush3.msra.mxu1 %v1656_v29 }
  0x59   : > { %4011 = vmatprep.subr.mxu1 %v1655_v30 }
  0x5a   : > { %4012 = vmatpush3.msra.mxu1 %v1655_v30 }
  0x5b   : > { %4013 = vmatprep.subr.mxu1 %v1654_v31 }
  0x5c   : > { %4014 = vmatpush3.msra.mxu1 %v1654_v31 }
  0x5d   : > { %4015 = vmatprep.subr.mxu1 %v1653_v32 }
  0x5e   : > { %4016 = vmatpush3.msra.mxu1 %v1653_v32 }
  0x5f   : > { %4017 = vmatprep.subr.mxu1 %v1652_v33 }
  0x60   : > { %4018 = vmatpush3.msra.mxu1 %v1652_v33 }
  0x61   : > { %4019 = vmatprep.subr.mxu1 %v1651_v34 }
  0x62   : > { %4020 = vmatpush3.msra.mxu1 %v1651_v34 }
  0x63   : > { %4021 = vmatprep.subr.mxu1 %v1650_v35 }
  0x64   : > { %4022 = vmatpush3.msra.mxu1 %v1650_v35 }
  0x65   : > { %4023 = vmatprep.subr.mxu1 %v1649_v36 }
  0x66   : > { %4024 = vmatpush3.msra.mxu1 %v1649_v36 }
  0x67   : > { %4025 = vmatprep.subr.mxu1 %v1648_v37 }
  0x68   : > { %4026 = vmatpush3.msra.mxu1 %v1648_v37 }
  0x69   : > { %4027 = vmatprep.subr.mxu1 %v1647_v38 }
  0x6a   : > { %4028 = vmatpush3.msra.mxu1 %v1647_v38 }
  0x6b   : > { %4029 = vmatprep.subr.mxu1 %v1646_v39 }
  0x6c   : > { %4030 = vmatpush3.msra.mxu1 %v1646_v39 }
  0x6d   : > { %4031 = vmatprep.subr.mxu1 %v1645_v40 }
  0x6e   : > { %4032 = vmatpush3.msra.mxu1 %v1645_v40 }
  0x6f   : > { %4160 = vmatprep.subr.mxu1 %v4632_v41 }
  0x94   : > { %v4662_v3 = vpop.permute.xlu0 %1449 }
  0x9f   : > { %v4672_v11 = vpop.permute.xlu0 %1444 }
  0xdd   : > { %v422_v42 = vpop.f32.mrf.mxu0  ;;  %v499_v43 = vpop.f32.mrf.mxu1 }
  0xdf   : > { %v424_v44 = vpop.f32.mrf.mxu0  ;;  %v501_v45 = vpop.f32.mrf.mxu1 }
  0xe1   : > { %v428_v46 = vpop.f32.mrf.mxu0  ;;  %v505_v47 = vpop.f32.mrf.mxu1 }
  0xe3   : > { %v430_v49 = vpop.f32.mrf.mxu0  ;;  %v507_v50 = vpop.f32.mrf.mxu1 }
  0xe5   : > { %v576_v52 = vpop.f32.mrf.mxu0  ;;  %v4642_v53 = vpop.f32.mrf.mxu1 }
  0xe7   : > { %v578_v54 = vpop.f32.mrf.mxu0  ;;  %v4644_v55 = vpop.f32.mrf.mxu1 }
  0xe9   : > { %v582_v56 = vpop.f32.mrf.mxu0  ;;  %v4646_v57 = vpop.f32.mrf.mxu1 }
  0xeb   : > { %v584_v58 = vpop.f32.mrf.mxu0  ;;  %v4648_v59 = vpop.f32.mrf.mxu1 }
  0xed   : > { %v4650_v60 = vpop.f32.mrf.mxu0  ;;  %v4652_v61 = vpop.f32.mrf.mxu1 }
  0xef   : > { %v4654_v62 = vpop.f32.mrf.mxu0  ;;  %v4656_v63 = vpop.f32.mrf.mxu1 }
  0xf1   : > { %v4658_v1 = vpop.f32.mrf.mxu0  ;;  %v4660_v2 = vpop.f32.mrf.mxu1 }
  0xf3   : > { %v4664_v4 = vpop.f32.mrf.mxu0  ;;  %v4666_v5 = vpop.f32.mrf.mxu1 }
  0xf5   : > { %v4668_v6 = vpop.f32.mrf.mxu0  ;;  %v967_v7 = vpop.f32.mrf.mxu1 }
  0xf6   : > { %v968_v10 = vadd.f32 %v967_v7, %v422_v42 }
  0xf7   : > { %v4670_v8 = vpop.f32.mrf.mxu0  ;;  %v969_v9 = vpop.f32.mrf.mxu1 }
  0xf8   : > { %v970_v12 = vadd.f32 %v969_v9, %v424_v44  ;;  %v1452_v20 = vadd.f32 %v4672_v11, %v968_v10 }
  0xf9   : > { %v4674_v13 = vpop.f32.mrf.mxu0  ;;  %v973_v14 = vpop.f32.mrf.mxu1 }
  0xfa   : > { %v974_v15 = vadd.f32 %v973_v14, %v428_v46  ;;  %v1453_v21 = vadd.f32 %v4672_v11, %v970_v12  ;;  %4237 = vtanh.f32 %v1452_v20 }
  0xfb   : > { %v4676_v16 = vpop.f32.mrf.mxu0  ;;  %v975_v17 = vpop.f32.mrf.mxu1 }
  0xfc   : > { %v1466_v18 = vadd.f32 %v4662_v3, %v974_v15  ;;  %v976_v19 = vadd.f32 %v975_v17, %v430_v49  ;;  %4239 = vtanh.f32 %v1453_v21 }
  0xfd   : > { %v1044_v22 = vpop.f32.mrf.mxu0  ;;  %v1121_v23 = vpop.f32.mrf.mxu1 }
  0xfe   : > { %v1467_v24 = vadd.f32 %v4662_v3, %v976_v19  ;;  %v1045_v25 = vadd.f32 %v1044_v22, %v499_v43  ;;  %v1122_v26 = vadd.f32 %v1121_v23, %v576_v52  ;;  %v1494_v27 = vmul.f32 0.5, %v1466_v18 }
  0xff   : > { %v1046_v28 = vpop.f32.mrf.mxu0  ;;  %v1123_v29 = vpop.f32.mrf.mxu1 }
 0x100   : > { %v1495_v30 = vmul.f32 0.5, %v1467_v24  ;;  %v1454_v31 = vadd.f32 %v4672_v11, %v1045_v25  ;;  %v1047_v32 = vadd.f32 %v1046_v28, %v501_v45  ;;  %v1456_v35 = vadd.f32 %v4672_v11, %v1122_v26 }
 0x101   : > { %v1050_v33 = vpop.f32.mrf.mxu0  ;;  %v1127_v34 = vpop.f32.mrf.mxu1  ;;  %v1124_v42 = vadd.f32 %v1123_v29, %v578_v54 }
 0x102   : > { %4241 = vtanh.f32 %v1495_v30  ;;  %v1051_v36 = vadd.f32 %v1050_v33, %v505_v47  ;;  %v1128_v37 = vadd.f32 %v1127_v34, %v582_v56  ;;  %v1455_v38 = vadd.f32 %v4672_v11, %v1047_v32 }
 0x103   : > { %4243 = vtanh.f32 %v1494_v27  ;;  %v1052_v39 = vpop.f32.mrf.mxu0  ;;  %v1129_v40 = vpop.f32.mrf.mxu1 }
 0x104   : > { %v1468_v43 = vadd.f32 %v4662_v3, %v1051_v36  ;;  %v1470_v44 = vadd.f32 %v4662_v3, %v1128_v37  ;;  %v1053_v46 = vadd.f32 %v1052_v39, %v507_v50  ;;  %4245 = vtanh.f32 %v1454_v31 }
 0x105   : > { %v1130_v45 = vadd.f32 %v1129_v40, %v584_v58  ;;  %v1198_v48 = vpop.f32.mrf.mxu0  ;;  %v1275_v49 = vpop.f32.mrf.mxu1  ;;  %4247 = vtanh.f32 %v1456_v35  ;;  %v1457_v50 = vadd.f32 %v4672_v11, %v1124_v42 }
 0x106   : > { %v1496_v51 = vmul.f32 0.5, %v1468_v43  ;;  %v1498_v52 = vmul.f32 0.5, %v1470_v44  ;;  %v1469_v47 = vadd.f32 %v4662_v3, %v1053_v46  ;;  %4249 = vtanh.f32 %v1455_v38 }
 0x107   : > { %v1471_v56 = vadd.f32 %v4662_v3, %v1130_v45  ;;  %v1199_v7 = vadd.f32 %v1198_v48, %v4642_v53  ;;  %v1276_v54 = vadd.f32 %v1275_v49, %v4650_v60  ;;  %v1200_v9 = vpop.f32.mrf.mxu0  ;;  %v1277_v10 = vpop.f32.mrf.mxu1 }
 0x108   : > { %4251 = vtanh.f32 %v1496_v51  ;;  %v1497_v58 = vmul.f32 0.5, %v1469_v47  ;;  %v1201_v12 = vadd.f32 %v1200_v9, %v4644_v55  ;;  %v1278_v20 = vadd.f32 %v1277_v10, %v4654_v62  ;;  %v4238_v26 = vpop.eup %4237 }
 0x109   : > { %4253 = vtanh.f32 %v1498_v52  ;;  %v1499_v14 = vmul.f32 0.5, %v1471_v56  ;;  %v1458_v15 = vadd.f32 %v4672_v11, %v1199_v7  ;;  %v1204_v17 = vpop.f32.mrf.mxu0  ;;  %v1281_v18 = vpop.f32.mrf.mxu1  ;;  %v1460_v19 = vadd.f32 %v4672_v11, %v1276_v54 }
 0x10a   : > { %4255 = vtanh.f32 %v1497_v58  ;;  %v1205_v53 = vadd.f32 %v1204_v17, %v4646_v57  ;;  %v1459_v60 = vadd.f32 %v4672_v11, %v1201_v12  ;;  %v1282_v21 = vadd.f32 %v1281_v18, %v4658_v1  ;;  %v4240_v29 = vpop.eup %4239 }
 0x10b   : > { %4257 = vtanh.f32 %v1499_v14  ;;  %v1206_v22 = vpop.f32.mrf.mxu0  ;;  %v1283_v55 = vpop.f32.mrf.mxu1  ;;  %v1461_v32 = vadd.f32 %v4672_v11, %v1278_v20 }
 0x10c   : > { %4259 = vtanh.f32 %v1457_v50  ;;  %v1472_v23 = vadd.f32 %v4662_v3, %v1205_v53  ;;  %v1207_v24 = vadd.f32 %v1206_v22, %v4648_v59  ;;  %v1284_v25 = vadd.f32 %v1283_v55, %v4664_v4  ;;  %v4729_v55 = vld [vmem:[%s5188_s4 + $0xf0] sm:$0xff] }
 0x10d   : > { %4261 = vtanh.f32 %v1458_v15  ;;  %v1474_v57 = vadd.f32 %v4662_v3, %v1282_v21  ;;  %v1352_v27 = vpop.f32.mrf.mxu0  ;;  %v1429_v28 = vpop.f32.mrf.mxu1 }
 0x10e   : > { %4263 = vtanh.f32 %v1460_v19  ;;  %v1500_v62 = vmul.f32 0.5, %v1472_v23  ;;  %v1473_v1 = vadd.f32 %v4662_v3, %v1207_v24  ;;  %v1475_v30 = vadd.f32 %v4662_v3, %v1284_v25 }
 0x10f   : > { %v4242_v31 = vpop.eup %4241  ;;  %4265 = vtanh.f32 %v1459_v60  ;;  %v1502_v59 = vmul.f32 0.5, %v1474_v57  ;;  %v1353_v4 = vadd.f32 %v1352_v27, %v4652_v61  ;;  %v1354_v33 = vpop.f32.mrf.mxu0  ;;  %v1430_v47 = vadd.f32 %v1429_v28, %v4668_v6 }
 0x110   : > { %v1431_v34 = vpop.f32.mrf.mxu1  ;;  %v4244_v35 = vpop.eup %4243  ;;  %v1523_v36 = vadd.f32 1.0, %v4242_v31  ;;  %4267 = vtanh.f32 %v1500_v62  ;;  %v1501_v37 = vmul.f32 0.5, %v1473_v1  ;;  %v1503_v38 = vmul.f32 0.5, %v1475_v30 }
 0x111   : > { %4269 = vtanh.f32 %v1502_v59  ;;  %v1358_v39 = vpop.f32.mrf.mxu0  ;;  %v4246_v42 = vpop.eup %4245  ;;  %v1522_v49 = vadd.f32 1.0, %v4244_v35  ;;  %v1462_v52 = vadd.f32 %v4672_v11, %v1353_v4  ;;  %v1432_v50 = vadd.f32 %v1431_v34, %v4670_v8  ;;  %v4751_v59 = vld [vmem:[%s5188_s4 + $0xe0] sm:$0xff] }
 0x112   : > { %v1435_v40 = vpop.f32.mrf.mxu1  ;;  %4271 = vtanh.f32 %v1501_v37  ;;  %v1359_v43 = vadd.f32 %v1358_v39, %v4660_v2  ;;  %v4708_v44 = vpop.eup %4247  ;;  %v1537_v46 = vmul.f32 0.5, %v1523_v36  ;;  %v1355_v2 = vadd.f32 %v1354_v33, %v4656_v63 }
 0x113   : > { %4273 = vtanh.f32 %v1503_v38  ;;  %v1436_v61 = vadd.f32 %v1435_v40, %v4674_v13  ;;  %v1360_v45 = vpop.f32.mrf.mxu0  ;;  %v4250_v51 = vpop.eup %4249  ;;  %v1536_v12 = vmul.f32 0.5, %v1522_v49  ;;  %v1465_v28 = vadd.f32 %v4672_v11, %v1432_v50 }
 0x114   : > { %v1437_v48 = vpop.f32.mrf.mxu1  ;;  %4275 = vtanh.f32 %v1461_v32  ;;  %v1476_v56 = vadd.f32 %v4662_v3, %v1359_v43  ;;  %v1361_v9 = vadd.f32 %v1360_v45, %v4666_v5  ;;  %v4719_v17 = vmul.f32 %v4240_v29, %v1537_v46  ;;  %v4740_v29 = vld [vmem:[%s5188_s4 + $0xe8] sm:$0xff]  ;;  %v4772_v43 = vld [vmem:[%s5188_s4 + $0xd0] sm:$0xff] }
 0x115   : > { %v4252_v7 = vpop.eup %4251  ;;  %v1478_v54 = vadd.f32 %v4662_v3, %v1436_v61  ;;  %v1438_v13 = vadd.f32 %v1437_v48, %v4676_v16  ;;  %v4723_v53 = vmul.f32 %v4238_v26, %v1536_v12  ;;  %v1463_v26 = vadd.f32 %v4672_v11, %v1355_v2  ;;  %v4782_v45 = vld [vmem:[%s5188_s4 + $0xc8] sm:$0xff] }
 0x116   : > { %v4254_v10 = vpop.eup %4253  ;;  %v1504_v58 = vmul.f32 0.5, %v1476_v56  ;;  %v1524_v14 = vadd.f32 1.0, %v4252_v7  ;;  %v1477_v18 = vadd.f32 %v4662_v3, %v1361_v9  ;;  %v1464_v32 = vadd.f32 %v4672_v11, %v1430_v47  ;;  %v4762_v11 = vld [vmem:[%s5188_s4 + $0xd8] sm:$0xff]  ;;  %v4792_v47 = vld [vmem:[%s5188_s4 + $0xc0] sm:$0xff] }
 0x117   : > { %v4256_v15 = vpop.eup %4255  ;;  %v1506_v6 = vmul.f32 0.5, %v1478_v54  ;;  %v1479_v63 = vadd.f32 %v4662_v3, %v1438_v13  ;;  %v1526_v21 = vadd.f32 1.0, %v4254_v10  ;;  %4033 = vmatprep.mubr.f32.mxu1 %v4723_v53  ;;  %v4802_v9 = vld [vmem:[%s5188_s4 + $0xb8] sm:$0xff] }
 0x118   : > { %v4258_v19 = vpop.eup %4257  ;;  %4277 = vtanh.f32 %v1504_v58  ;;  %v1538_v5 = vmul.f32 0.5, %v1524_v14  ;;  %v1525_v16 = vadd.f32 1.0, %v4256_v15  ;;  %v1505_v8 = vmul.f32 0.5, %v1477_v18  ;;  %4034 = vmatmul.mubr.f32.vlgmr.msra.gmra.mxu1 %v4719_v17  ;;  %v4812_v15 = vld [vmem:[%s5188_s4 + $0xb0] sm:$0xff] }
 0x119   : > { %v4260_v60 = vpop.eup %4259  ;;  %4279 = vtanh.f32 %v1506_v6  ;;  %v1507_v20 = vmul.f32 0.5, %v1479_v63  ;;  %v1527_v24 = vadd.f32 1.0, %v4258_v19  ;;  %v1540_v57 = vmul.f32 0.5, %v1526_v21  ;;  %4176 = vmatpush3.msra.mxu1 %v4632_v41 }
 0x11a   : > { %v4262_v22 = vpop.eup %4261  ;;  %4281 = vtanh.f32 %v1462_v52  ;;  %v4731_v3 = vmul.f32 %v4246_v42, %v1538_v5  ;;  %v1539_v23 = vmul.f32 0.5, %v1525_v16  ;;  %4161 = vmatprep.subr.mxu1 %v4729_v55  ;;  %v3849_v5 = vld [vmem:[%s5188_s4 + $0xa8] sm:$0xff] }
 0x11b   : > { %v4264_v25 = vpop.eup %4263  ;;  %4283 = vtanh.f32 %v1505_v8  ;;  %v1541_v30 = vmul.f32 0.5, %v1527_v24  ;;  %4177 = vmatpush3.msra.mxu1 %v4729_v55  ;;  %v4754_v4 = vmul.f32 %v4708_v44, %v1540_v57  ;;  %v3847_v24 = vld [vmem:[%s5188_s4 + $0x98] sm:$0xff]  ;;  %v3845_v57 = vld [vmem:[%s5188_s4 + $0x88] sm:$0xff] }
 0x11c   : > { %v4266_v27 = vpop.eup %4265  ;;  %4285 = vtanh.f32 %v1507_v20  ;;  %4036 = vmatprep.mubr.f32.mxu1 %v4731_v3  ;;  %v4743_v62 = vmul.f32 %v4250_v51, %v1539_v23  ;;  %4162 = vmatprep.subr.mxu1 %v4740_v29  ;;  %v3848_v20 = vld [vmem:[%s5188_s4 + $0xa0] sm:$0xff] }
 0x11d   : > { %v4268_v1 = vpop.eup %4267  ;;  %4287 = vtanh.f32 %v1463_v26  ;;  %4178 = vmatpush3.msra.mxu1 %v4740_v29  ;;  %v4766_v40 = vmul.f32 %v4260_v60, %v1541_v30  ;;  %v3846_v26 = vld [vmem:[%s5188_s4 + $0x90] sm:$0xff]  ;;  %v4896_v30 = vpop.permute.xlu1 %3651 }
 0x11e   : > { %v4270_v31 = vpop.eup %4269  ;;  %v1528_v33 = vadd.f32 1.0, %v4268_v1  ;;  %4037 = vmatmul.mubr.f32.gmra.mxu1 %v4743_v62  ;;  %4289 = vtanh.f32 %v1465_v28  ;;  %4163 = vmatprep.subr.mxu1 %v4751_v59 }
 0x11f   : > { %v4272_v34 = vpop.eup %4271  ;;  %v1530_v35 = vadd.f32 1.0, %v4270_v31  ;;  %4039 = vmatprep.mubr.f32.mxu1 %v4754_v4  ;;  %4291 = vtanh.f32 %v1464_v32  ;;  %4179 = vmatpush3.msra.mxu1 %v4751_v59 }
 0x120   : > { %v4274_v36 = vpop.eup %4273  ;;  %v1542_v37 = vmul.f32 0.5, %v1528_v33  ;;  %v1529_v38 = vadd.f32 1.0, %v4272_v34  ;;  %4164 = vmatprep.subr.mxu1 %v4762_v11 }
 0x121   : > { %v4276_v39 = vpop.eup %4275  ;;  %v1531_v42 = vadd.f32 1.0, %v4274_v36  ;;  %v1544_v61 = vmul.f32 0.5, %v1530_v35  ;;  %4180 = vmatpush3.msra.mxu1 %v4762_v11  ;;  %v1569_v32 = vpop.permute.xlu1 %1568 }
 0x122   : > { %v4774_v44 = vmul.f32 %v4262_v22, %v1542_v37  ;;  %v1543_v46 = vmul.f32 0.5, %v1529_v38  ;;  %4040 = vmatmul.mubr.f32.gmra.mxu1 %v4766_v40  ;;  %4165 = vmatprep.subr.mxu1 %v4772_v43  ;;  %v1564_v22 = vld [vmem:[%s5189_s5] sm:$0xff] }
 0x123   : > { %v1545_v51 = vmul.f32 0.5, %v1531_v42  ;;  %4181 = vmatpush3.msra.mxu1 %v4772_v43  ;;  %v4794_v56 = vmul.f32 %v4264_v25, %v1544_v61 }
 0x124   : > { %4042 = vmatprep.mubr.f32.mxu1 %v4774_v44  ;;  %v4785_v48 = vmul.f32 %v4266_v27, %v1543_v46  ;;  %4166 = vmatprep.subr.mxu1 %v4782_v45  ;;  %v3844_v27 = vld [vmem:[%s5188_s4 + $0x80] sm:$0xff] }
 0x125   : > { %v4278_v49 = vpop.eup %4277  ;;  %4182 = vmatpush3.msra.mxu1 %v4782_v45  ;;  %v4806_v58 = vmul.f32 %v4276_v39, %v1545_v51 }
 0x126   : > { %v4280_v52 = vpop.eup %4279  ;;  %v1532_v7 = vadd.f32 1.0, %v4278_v49  ;;  %4043 = vmatmul.mubr.f32.gmra.mxu1 %v4785_v48  ;;  %4167 = vmatprep.subr.mxu1 %v4792_v47  ;;  %v3860_v49 = vld [vmem:[%s5187_s3 + $0x8] sm:$0xff] }
 0x127   : > { %v4282_v2 = vpop.eup %4281  ;;  %4045 = vmatprep.mubr.f32.mxu1 %v4794_v56  ;;  %v1534_v10 = vadd.f32 1.0, %v4280_v52  ;;  %4183 = vmatpush3.msra.mxu1 %v4792_v47 }
 0x128   : > { %v4284_v54 = vpop.eup %4283  ;;  %v1546_v13 = vmul.f32 0.5, %v1532_v7  ;;  %4168 = vmatprep.subr.mxu1 %v4802_v9 }
 0x129   : > { %v4286_v50 = vpop.eup %4285  ;;  %v1533_v12 = vadd.f32 1.0, %v4284_v54  ;;  %4184 = vmatpush3.msra.mxu1 %v4802_v9  ;;  %v1548_v16 = vmul.f32 0.5, %v1534_v10 }
 0x12a   : > { %v1535_v14 = vadd.f32 1.0, %v4286_v50  ;;  %v4814_v6 = vmul.f32 %v4282_v2, %v1546_v13  ;;  %4046 = vmatmul.mubr.f32.gmra.mxu1 %v4806_v58  ;;  %v4288_v63 = vpop.eup %4287  ;;  %4169 = vmatprep.subr.mxu1 %v4812_v15 }
 0x12b   : > { %v1547_v18 = vmul.f32 0.5, %v1533_v12  ;;  %v4290_v60 = vpop.eup %4289  ;;  %4185 = vmatpush3.msra.mxu1 %v4812_v15 }
 0x12c   : > { %v1549_v19 = vmul.f32 0.5, %v1535_v14  ;;  %4048 = vmatprep.mubr.f32.mxu1 %v4814_v6  ;;  %v4292_v23 = vpop.eup %4291  ;;  %4170 = vmatprep.subr.mxu1 %v3849_v5  ;;  %v1796_v14 = vld [vmem:[%s5187_s3] sm:$0xff] }
 0x12d   : > { %v4824_v8 = vmul.f32 %v4288_v63, %v1547_v18  ;;  %4186 = vmatpush3.msra.mxu1 %v3849_v5  ;;  %v4840_v25 = vmul.f32 %v4292_v23, %v1548_v16  ;;  %v3889_v18 = vld [vmem:[%s5188_s4 + $0x170] sm:$0xff]  ;;  %v3888_v63 = vld [vmem:[%s5188_s4 + $0x168] sm:$0xff] }
 0x12e   : > { %v4830_v21 = vmul.f32 %v4290_v60, %v1549_v19  ;;  %4171 = vmatprep.subr.mxu1 %v3848_v20  ;;  %v3887_v19 = vld [vmem:[%s5188_s4 + $0x160] sm:$0xff]  ;;  %v3884_v16 = vld [vmem:[%s5188_s4 + $0x148] sm:$0xff] }
 0x12f   : > { %4049 = vmatmul.mubr.f32.gmra.mxu1 %v4824_v8  ;;  %v3883_v60 = vld [vmem:[%s5188_s4 + $0x140] sm:$0xff]  ;;  %v3880_v23 = vld [vmem:[%s5188_s4 + $0x128] sm:$0xff] }
 0x130   : > { %3997 = vmatpush3.msra.mxu0 %v4830_v21  ;;  %4187 = vmatpush3.msra.mxu1 %v3848_v20 }
 0x131   : > { %3999 = vmatmul.mubr.msk.f32.vlgmr.msra.gmra.mxu0 %vm349_vm0, %v1564_v22  ;;  %4051 = vmatprep.mubr.f32.mxu1 %v4840_v25  ;;  %v3881_v22 = vld [vmem:[%s5188_s4 + $0x130] sm:$0xff] }
 0x132   : > { %4172 = vmatprep.subr.mxu1 %v3847_v24  ;;  %4054 = vmatprep.subr.mxu0 %v4632_v41 }
 0x133   : > { %4188 = vmatpush3.msra.mxu1 %v3847_v24  ;;  %4055 = vmatpush3.msra.mxu0 %v4632_v41 }
 0x134   : > { %4173 = vmatprep.subr.mxu1 %v3846_v26  ;;  %4086 = vmatprep.mubr.f32.mxu0 %v4723_v53 }
 0x135   : > { %4056 = vmatprep.subr.mxu0 %v4729_v55  ;;  %4189 = vmatpush3.msra.mxu1 %v3846_v26 }
 0x136   : > { %4052 = vmatmul.mubr.f32.gmra.mxu1 %v4830_v21  ;;  %4057 = vmatpush3.msra.mxu0 %v4729_v55 }
 0x137   : > { %4174 = vmatprep.subr.mxu1 %v3845_v57  ;;  %4058 = vmatprep.subr.mxu0 %v4740_v29 }
 0x138   : > { %4190 = vmatpush3.msra.mxu1 %v3845_v57  ;;  %4098 = vmatprep.mubr.f32.mxu1 %v4794_v56 }
 0x139   : > { %4059 = vmatpush3.msra.mxu0 %v4740_v29  ;;  %4175 = vmatprep.subr.mxu1 %v3844_v27 }
 0x13a   : > { %4060 = vmatprep.subr.mxu0 %v4751_v59  ;;  %4191 = vmatpush3.msra.mxu1 %v3844_v27 }
 0x13b   : > { %4061 = vmatpush3.msra.mxu0 %v4751_v59  ;;  %4099 = vmatmul.mubr.f32.vlgmr.msra.gmra.mxu1 %v4806_v58 }
 0x13c   : > { %4062 = vmatprep.subr.mxu0 %v4762_v11  ;;  %4101 = vmatprep.mubr.f32.mxu1 %v4814_v6 }
 0x13d   : > { %4063 = vmatpush3.msra.mxu0 %v4762_v11 }
 0x13e   : > { %4064 = vmatprep.subr.mxu0 %v4772_v43 }
 0x13f   : > { %4065 = vmatpush3.msra.mxu0 %v4772_v43  ;;  %4102 = vmatmul.mubr.f32.gmra.mxu1 %v4824_v8 }
 0x140   : > { %4066 = vmatprep.subr.mxu0 %v4782_v45  ;;  %4104 = vmatprep.mubr.f32.mxu1 %v4840_v25 }
 0x141   : > { %4067 = vmatpush3.msra.mxu0 %v4782_v45 }
 0x142   : > { %4068 = vmatprep.subr.mxu0 %v4792_v47 }
 0x143   : > { %4069 = vmatpush3.msra.mxu0 %v4792_v47  ;;  %4105 = vmatmul.mubr.f32.gmra.mxu1 %v4830_v21 }
 0x144   : > { %4070 = vmatprep.subr.mxu0 %v4802_v9  ;;  %2018 = vmatprep.mubr.f32.mxu1 %v4355_v0 }
 0x145   : > { %4071 = vmatpush3.msra.mxu0 %v4802_v9 }
 0x146   : > { %4072 = vmatprep.subr.mxu0 %v4812_v15 }
 0x147   : > { %4073 = vmatpush3.msra.mxu0 %v4812_v15  ;;  %v3890_v15 = vld [vmem:[%s5188_s4 + $0x178] sm:$0xff] }
 0x148   : > { %4074 = vmatprep.subr.mxu0 %v3849_v5 }
 0x149   : > { %4075 = vmatpush3.msra.mxu0 %v3849_v5  ;;  %v3885_v5 = vld [vmem:[%s5188_s4 + $0x150] sm:$0xff] }
 0x14a   : > { %4076 = vmatprep.subr.mxu0 %v3848_v20 }
 0x14b   : > { %4077 = vmatpush3.msra.mxu0 %v3848_v20  ;;  %v3882_v20 = vld [vmem:[%s5188_s4 + $0x138] sm:$0xff] }
 0x14c   : > { %4078 = vmatprep.subr.mxu0 %v3847_v24 }
 0x14d   : > { %4079 = vmatpush3.msra.mxu0 %v3847_v24  ;;  %v3879_v24 = vld [vmem:[%s5188_s4 + $0x120] sm:$0xff] }
 0x14e   : > { %4080 = vmatprep.subr.mxu0 %v3846_v26 }
 0x14f   : > { %4081 = vmatpush3.msra.mxu0 %v3846_v26  ;;  %v3878_v26 = vld [vmem:[%s5188_s4 + $0x118] sm:$0xff] }
 0x150   : > { %4082 = vmatprep.subr.mxu0 %v3845_v57 }
 0x151   : > { %4083 = vmatpush3.msra.mxu0 %v3845_v57  ;;  %v3877_v57 = vld [vmem:[%s5188_s4 + $0x110] sm:$0xff] }
 0x152   : > { %4084 = vmatprep.subr.mxu0 %v3844_v27 }
 0x153   : > { %4085 = vmatpush3.msra.mxu0 %v3844_v27  ;;  %v3876_v27 = vld [vmem:[%s5188_s4 + $0x108] sm:$0xff] }
 0x154   : > { %4087 = vmatmul.mubr.f32.vlgmr.msra.gmra.mxu0 %v4719_v17 }
 0x155   : > { %4089 = vmatprep.mubr.f32.mxu0 %v4731_v3 }
 0x158   : > { %4090 = vmatmul.mubr.f32.gmra.mxu0 %v4743_v62 }
 0x159   : > { %4092 = vmatprep.mubr.f32.mxu0 %v4754_v4 }
 0x15c   : > { %4093 = vmatmul.mubr.f32.gmra.mxu0 %v4766_v40 }
 0x15d   : > { %4095 = vmatprep.mubr.f32.mxu0 %v4774_v44 }
 0x160   : > { %4096 = vmatmul.mubr.f32.gmra.mxu0 %v4785_v48 }
 0x161   : > { %2160 = vmatprep.mubr.f32.mxu0 %v4355_v0 }
 0x1d8   : > { %v4035_v41 = vpop.f32.mrf.mxu1 }
 0x1da   : > { %v4890_v55 = vpop.f32.mrf.mxu1 }
 0x1de   : > { %v4038_v28 = vpop.f32.mrf.mxu1 }
 0x1e0   : > { %v4892_v29 = vpop.f32.mrf.mxu1 }
 0x1e2   : > { %v4894_v1 = vpop.f32.mrf.mxu1 }
 0x1e4   : > { %v4899_v31 = vpop.f32.mrf.mxu1 }
 0x1e6   : > { %v4044_v59 = vpop.f32.mrf.mxu1 }
 0x1e8   : > { %v1757_v36 = vpop.f32.mrf.mxu1 }
 0x1ea   : > { %v4047_v11 = vpop.f32.mrf.mxu1 }
 0x1ec   : > { %v4908_v37 = vpop.f32.mrf.mxu1 }
 0x1ef   : > { %v4050_v38 = vpop.f32.mrf.mxu1 }
 0x1f1   : > { %v1640_v33 = vpop.f32.mrf.mxu0  ;;  %v4910_v39 = vpop.f32.mrf.mxu1 }
 0x1f2   : > { %v1641_v34 = vadd.f32 %v1640_v33, %v1569_v32 }
 0x1f3   : > { %v4000_v35 = vpop.f32.mrf.mxu0 }
 0x1f4   : > { %1644 = vst [vmem:[%s306_s18] sm:$0xff] %v1641_v34 }
 0x1f6   : > { %v4912_v42 = vpop.f32.mrf.mxu1 }
 0x1f8   : > { %v4914_v43 = vpop.f32.mrf.mxu1 }
 0x1fb   : > { %v4100_v46 = vpop.f32.mrf.mxu1 }
 0x1fd   : > { %v1920_v61 = vpop.f32.mrf.mxu1 }
 0x1ff   : > { %v4103_v52 = vpop.f32.mrf.mxu1 }
 0x201   : > { %v1930_v2 = vpop.f32.mrf.mxu1 }
 0x203   : > { %v4106_v13 = vpop.f32.mrf.mxu1 }
 0x205   : > { %v1940_v12 = vpop.f32.mrf.mxu1 }
 0x214   : > { %v4088_v45 = vpop.f32.mrf.mxu0 }
 0x215   : > { %1984 = vmatprep.subr.mxu1 %v4088_v45 }
 0x216   : > { %v1880_v51 = vpop.f32.mrf.mxu0 }
 0x217   : > { %1985 = vmatpush1.msra.mxu1 %v1880_v51 }
 0x218   : > { %v4091_v47 = vpop.f32.mrf.mxu0  ;;  %3861 = vmatmul.mubr.msk.f32.vlgmr.msra.gmra.mxu1 %vm349_vm0, %v3860_v49 }
 0x219   : > { %2055 = vmatprep.subr.mxu1 %v4091_v47  ;;  %2089 = vmatprep.mubr.f32.mxu1 %v4355_v0 }
 0x21a   : > { %v1890_v7 = vpop.f32.mrf.mxu0 }
 0x21b   : > { %2056 = vmatpush1.msra.mxu1 %v1890_v7 }
 0x21c   : > { %v4094_v54 = vpop.f32.mrf.mxu0  ;;  %3862 = vmatmul.mubr.msk.f32.vlgmr.msra.gmra.mxu1 %vm349_vm0, %v3860_v49 }
 0x21d   : > { %2126 = vmatprep.subr.mxu0 %v4094_v54  ;;  %2231 = vmatprep.mubr.f32.mxu1 %v4355_v0 }
 0x21e   : > { %v1900_v9 = vpop.f32.mrf.mxu0 }
 0x21f   : > { %2127 = vmatpush1.msra.mxu0 %v1900_v9 }
 0x220   : > { %v4097_v10 = vpop.f32.mrf.mxu0  ;;  %3863 = vmatmul.mubr.msk.f32.vlgmr.msra.gmra.mxu0 %vm349_vm0, %v3860_v49  ;;  %2268 = vmatprep.subr.mxu0 %v4100_v46 }
 0x221   : > { %2197 = vmatprep.subr.mxu1 %v4097_v10  ;;  %2269 = vmatpush1.msra.mxu0 %v1920_v61 }
 0x222   : > { %v1910_v50 = vpop.f32.mrf.mxu0  ;;  %2410 = vmatprep.subr.mxu0 %v4106_v13  ;;  %2302 = vmatprep.mubr.f32.mxu0 %v4355_v0 }
 0x223   : > { %2198 = vmatpush1.msra.mxu1 %v1910_v50 }
 0x224   : > { %3864 = vmatmul.mubr.msk.f32.vlgmr.msra.gmra.mxu1 %vm349_vm0, %v3860_v49  ;;  %3865 = vmatmul.mubr.msk.f32.vlgmr.msra.gmra.mxu0 %vm349_vm0, %v3860_v49 }
 0x225   : > { %2339 = vmatprep.subr.mxu1 %v4103_v52  ;;  %2411 = vmatpush1.msra.mxu0 %v1940_v12 }
 0x226   : > { %2340 = vmatpush1.msra.mxu1 %v1930_v2  ;;  %2555 = vmatprep.subr.mxu0 %v4038_v28 }
 0x227   : > { %2484 = vmatprep.subr.mxu1 %v4035_v41  ;;  %2373 = vmatprep.mubr.f32.mxu1 %v4355_v0  ;;  %v3875_v41 = vld [vmem:[%s5188_s4 + $0x100] sm:$0xff] }
 0x228   : > { %2444 = vmatprep.mubr.f32.mxu0 %v4355_v0  ;;  %3866 = vmatmul.mubr.msk.f32.vlgmr.msra.gmra.mxu1 %vm349_vm0, %v3860_v49 }
 0x229   : > { %3867 = vmatmul.mubr.msk.f32.vlgmr.msra.gmra.mxu0 %vm349_vm0, %v3860_v49  ;;  %2485 = vmatpush1.msra.mxu1 %v4890_v55  ;;  %v3891_v55 = vld [vmem:[%s5187_s3 + $0x10] sm:$0xff] }
 0x22a   : > { %2556 = vmatpush1.msra.mxu0 %v4892_v29  ;;  %2626 = vmatprep.subr.mxu1 %v4894_v1 }
 0x22b   : > { %2697 = vmatprep.subr.mxu0 %v4044_v59  ;;  %2518 = vmatprep.mubr.f32.mxu1 %v4355_v0 }
 0x22c   : > { %2589 = vmatprep.mubr.f32.mxu0 %v4355_v0  ;;  %3868 = vmatmul.mubr.msk.f32.vlgmr.msra.gmra.mxu1 %vm349_vm0, %v1796_v14 }
 0x22d   : > { %3869 = vmatmul.mubr.msk.f32.vlgmr.msra.gmra.mxu0 %vm349_vm0, %v1796_v14  ;;  %2627 = vmatpush1.msra.mxu1 %v4899_v31 }
 0x22e   : > { %2698 = vmatpush1.msra.mxu0 %v1757_v36  ;;  %2768 = vmatprep.subr.mxu1 %v4047_v11 }
 0x22f   : > { %2839 = vmatprep.subr.mxu0 %v4050_v38  ;;  %2660 = vmatprep.mubr.f32.mxu1 %v4355_v0 }
 0x230   : > { %2731 = vmatprep.mubr.f32.mxu0 %v4355_v0  ;;  %3870 = vmatmul.mubr.msk.f32.vlgmr.msra.gmra.mxu1 %vm349_vm0, %v1796_v14 }
 0x231   : > { %3871 = vmatmul.mubr.msk.f32.vlgmr.msra.gmra.mxu0 %vm349_vm0, %v1796_v14  ;;  %2769 = vmatpush1.msra.mxu1 %v4908_v37 }
 0x232   : > { %2840 = vmatpush1.msra.mxu0 %v4910_v39  ;;  %2910 = vmatprep.subr.mxu1 %v4912_v42 }
 0x233   : > { %2802 = vmatprep.mubr.f32.mxu1 %v4355_v0  ;;  %2873 = vmatprep.mubr.f32.mxu0 %v4355_v0 }
 0x234   : > { %4107 = vmatprep.subr.mxu0 %v3890_v15  ;;  %3872 = vmatmul.mubr.msk.f32.vlgmr.msra.gmra.mxu1 %vm349_vm0, %v1796_v14 }
 0x235   : > { %3873 = vmatmul.mubr.msk.f32.vlgmr.msra.gmra.mxu0 %vm349_vm0, %v1796_v14  ;;  %2911 = vmatpush1.msra.mxu1 %v4914_v43 }
 0x236   : > { %4108 = vmatpush3.msra.mxu0 %v3890_v15  ;;  %4139 = vmatprep.mubr.f32.mxu0 %v4723_v53  ;;  %v3886_v53 = vld [vmem:[%s5188_s4 + $0x158] sm:$0xff] }
 0x237   : > { %4109 = vmatprep.subr.mxu0 %v3889_v18  ;;  %2944 = vmatprep.mubr.f32.mxu1 %v4355_v0 }
 0x238   : > { %4110 = vmatpush3.msra.mxu0 %v3889_v18  ;;  %3874 = vmatmul.mubr.msk.f32.vlgmr.msra.gmra.mxu1 %vm349_vm0, %v1796_v14 }
 0x239   : > { %4111 = vmatprep.subr.mxu0 %v3888_v63  ;;  %3172 = vmatprep.mubr.f32.mxu1 %v4355_v0 }
 0x23a   : > { %4112 = vmatpush3.msra.mxu0 %v3888_v63 }
 0x23b   : > { %4113 = vmatprep.subr.mxu0 %v3887_v19 }
 0x23c   : > { %4114 = vmatpush3.msra.mxu0 %v3887_v19 }
 0x23d   : > { %4115 = vmatprep.subr.mxu0 %v3886_v53 }
 0x23e   : > { %4116 = vmatpush3.msra.mxu0 %v3886_v53 }
 0x23f   : > { %4117 = vmatprep.subr.mxu0 %v3885_v5 }
 0x240   : > { %4118 = vmatpush3.msra.mxu0 %v3885_v5 }
 0x241   : > { %4119 = vmatprep.subr.mxu0 %v3884_v16 }
 0x242   : > { %4120 = vmatpush3.msra.mxu0 %v3884_v16 }
 0x243   : > { %4121 = vmatprep.subr.mxu0 %v3883_v60 }
 0x244   : > { %4122 = vmatpush3.msra.mxu0 %v3883_v60 }
 0x245   : > { %4123 = vmatprep.subr.mxu0 %v3882_v20 }
 0x246   : > { %4124 = vmatpush3.msra.mxu0 %v3882_v20 }
 0x247   : > { %4125 = vmatprep.subr.mxu0 %v3881_v22 }
 0x248   : > { %4126 = vmatpush3.msra.mxu0 %v3881_v22 }
 0x249   : > { %4127 = vmatprep.subr.mxu0 %v3880_v23 }
 0x24a   : > { %4128 = vmatpush3.msra.mxu0 %v3880_v23 }
 0x24b   : > { %4129 = vmatprep.subr.mxu0 %v3879_v24 }
 0x24c   : > { %4130 = vmatpush3.msra.mxu0 %v3879_v24 }
 0x24d   : > { %4131 = vmatprep.subr.mxu0 %v3878_v26 }
 0x24e   : > { %4132 = vmatpush3.msra.mxu0 %v3878_v26 }
 0x24f   : > { %4133 = vmatprep.subr.mxu0 %v3877_v57 }
 0x250   : > { %4134 = vmatpush3.msra.mxu0 %v3877_v57 }
 0x251   : > { %4135 = vmatprep.subr.mxu0 %v3876_v27 }
 0x252   : > { %4136 = vmatpush3.msra.mxu0 %v3876_v27 }
 0x253   : > { %4137 = vmatprep.subr.mxu0 %v3875_v41 }
 0x254   : > { %4138 = vmatpush3.msra.mxu0 %v3875_v41 }
 0x255   : > { %4140 = vmatmul.mubr.f32.vlgmr.msra.gmra.mxu0 %v4719_v17 }
 0x256   : > { %4142 = vmatprep.mubr.f32.mxu0 %v4731_v3 }
 0x259   : > { %4143 = vmatmul.mubr.f32.gmra.mxu0 %v4743_v62 }
 0x25a   : > { %4145 = vmatprep.mubr.f32.mxu0 %v4754_v4 }
 0x25d   : > { %4146 = vmatmul.mubr.f32.gmra.mxu0 %v4766_v40 }
 0x25e   : > { %4148 = vmatprep.mubr.f32.mxu0 %v4774_v44 }
 0x261   : > { %4149 = vmatmul.mubr.f32.gmra.mxu0 %v4785_v48 }
 0x262   : > { %4151 = vmatprep.mubr.f32.mxu0 %v4794_v56 }
 0x265   : > { %4152 = vmatmul.mubr.f32.gmra.mxu0 %v4806_v58 }
 0x266   : > { %4154 = vmatprep.mubr.f32.mxu0 %v4814_v6 }
 0x269   : > { %4155 = vmatmul.mubr.f32.gmra.mxu0 %v4824_v8 }
 0x26a   : > { %4157 = vmatprep.mubr.f32.mxu0 %v4840_v25 }
 0x26d   : > { %4158 = vmatmul.mubr.f32.gmra.mxu0 %v4830_v21 }
 0x2e0   : > { %v5019_v17 = vpop.f32.mrf.mxu0 }
 0x2e2   : > { %v5021_v3 = vpop.f32.mrf.mxu0 }
 0x2e4   : > { %v5023_v62 = vpop.f32.mrf.mxu0 }
 0x2e6   : > { %v5025_v4 = vpop.f32.mrf.mxu0 }
 0x2e9   : > { %v5027_v40 = vpop.f32.mrf.mxu0 }
 0x2eb   : > { %v5029_v44 = vpop.f32.mrf.mxu0 }
 0x2ed   : > { %v5031_v48 = vpop.f32.mrf.mxu0 }
 0x2ef   : > { %v5033_v56 = vpop.f32.mrf.mxu0 }
 0x2f1   : > { %v5035_v58 = vpop.f32.mrf.mxu0 }
 0x2f3   : > { %v5037_v6 = vpop.f32.mrf.mxu0 }
 0x2f5   : > { %v5039_v8 = vpop.f32.mrf.mxu0 }
 0x2f7   : > { %v5041_v21 = vpop.f32.mrf.mxu0 }
 0x315   : > { %v4141_v25 = vpop.f32.mrf.mxu0 }
 0x316   : > { %3138 = vmatprep.subr.mxu1 %v4141_v25 }
 0x317   : > { %v3034_v28 = vpop.f32.mrf.mxu0 }
 0x318   : > { %3139 = vmatpush1.msra.mxu1 %v3034_v28 }
 0x319   : > { %v4144_v29 = vpop.f32.mrf.mxu0  ;;  %3892 = vmatmul.mubr.msk.f32.vlgmr.msra.gmra.mxu1 %vm349_vm0, %v3891_v55 }
 0x31a   : > { %3209 = vmatprep.subr.mxu1 %v4144_v29  ;;  %3243 = vmatprep.mubr.f32.mxu1 %v4355_v0 }
 0x31b   : > { %v3044_v1 = vpop.f32.mrf.mxu0 }
 0x31c   : > { %3210 = vmatpush1.msra.mxu1 %v3044_v1 }
 0x31d   : > { %v4147_v31 = vpop.f32.mrf.mxu0  ;;  %3893 = vmatmul.mubr.msk.f32.vlgmr.msra.gmra.mxu1 %vm349_vm0, %v3891_v55 }
 0x31e   : > { %3280 = vmatprep.subr.mxu1 %v4147_v31  ;;  %3314 = vmatprep.mubr.f32.mxu1 %v4355_v0 }
 0x31f   : > { %v3054_v32 = vpop.f32.mrf.mxu0 }
 0x320   : > { %3281 = vmatpush1.msra.mxu1 %v3054_v32 }
 0x321   : > { %v4150_v59 = vpop.f32.mrf.mxu0  ;;  %3894 = vmatmul.mubr.msk.f32.vlgmr.msra.gmra.mxu1 %vm349_vm0, %v3891_v55 }
 0x322   : > { %3351 = vmatprep.subr.mxu1 %v4150_v59  ;;  %3385 = vmatprep.mubr.f32.mxu1 %v4355_v0 }
 0x323   : > { %v3064_v33 = vpop.f32.mrf.mxu0 }
 0x324   : > { %3352 = vmatpush1.msra.mxu1 %v3064_v33 }
 0x325   : > { %v4153_v34 = vpop.f32.mrf.mxu0  ;;  %3895 = vmatmul.mubr.msk.f32.vlgmr.msra.gmra.mxu1 %vm349_vm0, %v3891_v55 }
 0x326   : > { %3422 = vmatprep.subr.mxu1 %v4153_v34  ;;  %3456 = vmatprep.mubr.f32.mxu1 %v4355_v0 }
 0x327   : > { %v3074_v35 = vpop.f32.mrf.mxu0 }
 0x328   : > { %3423 = vmatpush1.msra.mxu1 %v3074_v35 }
 0x329   : > { %v4156_v36 = vpop.f32.mrf.mxu0  ;;  %3896 = vmatmul.mubr.msk.f32.vlgmr.msra.gmra.mxu1 %vm349_vm0, %v3891_v55 }
 0x32a   : > { %3493 = vmatprep.subr.mxu1 %v4156_v36  ;;  %3527 = vmatprep.mubr.f32.mxu1 %v4355_v0 }
 0x32b   : > { %v3084_v11 = vpop.f32.mrf.mxu0 }
 0x32c   : > { %3494 = vmatpush1.msra.mxu1 %v3084_v11 }
 0x32d   : > { %v4159_v37 = vpop.f32.mrf.mxu0  ;;  %3897 = vmatmul.mubr.msk.f32.vlgmr.msra.gmra.mxu1 %vm349_vm0, %v3891_v55 }
 0x32e   : > { %3564 = vmatprep.subr.mxu1 %v4159_v37  ;;  %3598 = vmatprep.mubr.f32.mxu1 %v4355_v0 }
 0x32f   : > { %v3094_v38 = vpop.f32.mrf.mxu0 }
 0x330   : > { %3565 = vmatpush1.msra.mxu1 %v3094_v38 }
 0x331   : > { %3898 = vmatmul.mubr.msk.f32.vlgmr.msra.gmra.mxu1 %vm349_vm0, %v3891_v55 }
 0x332   : > { %4306 = shalt.err (!%p4303_p3)
}
 0x333   : > { %s4307_s9 = scalar_lea.hbm %s3721_s22, 128  ;;  %s4311_s18 = scalar_lea.hbm %s5192_s8, 256 }
 0x334   : > { %p4308_p4 = scmp.ne.s32.totalorder %s3721_s22, %s4307_s9  ;;  %p4312_p9 = scmp.lt.s32.totalorder %s3721_s22, %s5192_s8 }
 0x335   : > { %p4313_p10 = scmp.lt.s32.totalorder %s4311_s18, %s4307_s9 }
 0x336   : > { %p4309_p7 = pnand %p4308_p4, %p4442_p5 }
 0x337   : > { %p4314_p11 = por %p4313_p10, %p4312_p9 }
 0x338   : > { %p4310_p8 = pneg %p4309_p7 }
 0x33a   : > { %p4315_p12 = pnand %p4314_p11, %p4310_p8 }
 0x33c   : > { %4318 = shalt.err (!%p4315_p12)
}
 0x33d   : > { %4193 = dma.vmem_to_hbm [thread:$0]  (%p4442_p5), %s3724_s12, 128, %s3721_s22, %s3707_s24   ;;  %v2020_v0 = vpop.f32.mrf.mxu1  ;;  %v3619_v12 = vld [vmem:[%s4465_s23 + $0x10] sm:$0xff]  ;;  %v3620_v63 = vld [vmem:[%s4465_s23 + $0x18] sm:$0xff]  ;;  %v3621_v60 = vld [vmem:[%s4465_s23 + $0x20] sm:$0xff]  ;;  %v5094_v26 = vpop.permute.xlu0 %3670 }
 0x33e   : > { %s4192_s0 = smul.u32 112, %s4459_s19  ;;  %v3622_v41 = vld [vmem:[%s4465_s23 + $0x28] sm:$0xff]  ;;  %v3624_v35 = vld [vmem:[%s4465_s23 + $0x38] sm:$0xff] }
 0x33f   : > { %v2022_v39 = vpop.f32.mrf.mxu1 }
 0x340   : > { %s5100_s19 = scalar_lea.vmem %s5191_s7, %s4192_s0 }
 0x341   : > { %v2091_v42 = vpop.f32.mrf.mxu1 }
 0x342   : > { %v2592_v19 = vadd.f32 %v5031_v48, %v2091_v42 }
 0x343   : > { %v2093_v43 = vpop.f32.mrf.mxu1 }
 0x344   : > { %v2594_v20 = vadd.f32 %v5033_v56, %v2093_v43 }
 0x345   : > { %v2233_v46 = vpop.f32.mrf.mxu1 }
 0x346   : > { %v2734_v33 = vadd.f32 %v5035_v58, %v2233_v46 }
 0x347   : > { %v2235_v61 = vpop.f32.mrf.mxu1 }
 0x348   : > { %v2736_v38 = vadd.f32 %v5037_v6, %v2235_v61 }
 0x349   : > { %v5079_v45 = vpop.f32.mrf.mxu1 }
 0x34b   : > { %v5081_v49 = vpop.f32.mrf.mxu1 }
 0x34d   : > { %v2520_v51 = vpop.f32.mrf.mxu1 }
 0x34e   : > { %v2521_v10 = vadd.f32 %v2520_v51, %v2020_v0 }
 0x34f   : > { %v2522_v52 = vpop.f32.mrf.mxu1 }
 0x350   : > { %v2523_v14 = vadd.f32 %v2522_v52, %v2022_v39  ;;  %v3625_v39 = vld [vmem:[%s4465_s23 + $0x40] sm:$0xff] }
 0x351   : > { %v2662_v47 = vpop.f32.mrf.mxu1 }
 0x352   : > { %v2663_v57 = vadd.f32 %v2662_v47, %v5019_v17  ;;  %v3623_v17 = vld [vmem:[%s4465_s23 + $0x30] sm:$0xff]  ;;  %v3626_v47 = vld [vmem:[%s4465_s23 + $0x48] sm:$0xff] }
 0x353   : > { %v2664_v7 = vpop.f32.mrf.mxu1 }
 0x354   : > { %v2665_v28 = vadd.f32 %v2664_v7, %v5021_v3 }
 0x355   : > { %v2804_v2 = vpop.f32.mrf.mxu1 }
 0x356   : > { %v2805_v51 = vadd.f32 %v2804_v2, %v5023_v62 }
 0x357   : > { %v2806_v54 = vpop.f32.mrf.mxu1 }
 0x359   : > { %v5083_v9 = vpop.f32.mrf.mxu1 }
 0x35b   : > { %v5085_v13 = vpop.f32.mrf.mxu1 }
 0x3d9   : > { %v3174_v50 = vpop.f32.mrf.mxu1 }
 0x3da   : > { %v3605_v15 = vadd.f32 %v3174_v50, %v2521_v10  ;;  %v2807_v50 = vadd.f32 %v2806_v54, %v5025_v4 }
 0x3db   : > { %v3176_v18 = vpop.f32.mrf.mxu1 }
 0x3dc   : > { %v3635_v53 = vadd.f32 %v3619_v12, %v3605_v15  ;;  %v3606_v5 = vadd.f32 %v3176_v18, %v2523_v14  ;;  %v3627_v14 = vld [vmem:[%s4465_s23 + $0x50] sm:$0xff] }
 0x3dd   : > { %v3245_v16 = vpop.f32.mrf.mxu1 }
 0x3de   : > { %v3654_v22 = vmul.f32 %v4896_v30, %v3635_v53  ;;  %v3636_v23 = vadd.f32 %v3620_v63, %v3606_v5  ;;  %v3607_v24 = vadd.f32 %v3245_v16, %v2592_v19  ;;  %v2876_v63 = vadd.f32 %v5039_v8, %v5079_v45  ;;  %v3628_v53 = vld [vmem:[%s4465_s23 + $0x58] sm:$0xff] }
 0x3df   : > { %v3247_v27 = vpop.f32.mrf.mxu1 }
 0x3e0   : > { %v3673_v48 = vadd.f32 %v5094_v26, %v3654_v22  ;;  %v3655_v56 = vmul.f32 %v4896_v30, %v3636_v23  ;;  %v3637_v25 = vadd.f32 %v3621_v60, %v3607_v24  ;;  %v3608_v55 = vadd.f32 %v3247_v27, %v2594_v20  ;;  %v3629_v22 = vld [vmem:[%s4465_s23 + $0x60] sm:$0xff] }
 0x3e1   : > { %v3316_v29 = vpop.f32.mrf.mxu1  ;;  %v2878_v60 = vadd.f32 %v5041_v21, %v5081_v49 }
 0x3e2   : > { %3687 = vst [vmem:[%s5100_s19] sm:$0xff] %v3673_v48  ;;  %v3674_v1 = vadd.f32 %v5094_v26, %v3655_v56  ;;  %v3656_v31 = vmul.f32 %v4896_v30, %v3637_v25  ;;  %v3638_v32 = vadd.f32 %v3622_v41, %v3608_v55  ;;  %v3609_v59 = vadd.f32 %v3316_v29, %v2663_v57  ;;  %v3630_v41 = vld [vmem:[%s4465_s23 + $0x68] sm:$0xff] }
 0x3e3   : > { %v3318_v34 = vpop.f32.mrf.mxu1  ;;  %v2947_v57 = vadd.f32 %v5083_v9, %v5027_v40  ;;  %v2949_v25 = vadd.f32 %v5085_v13, %v5029_v44 }
 0x3e4   : > { %3688 = vst [vmem:[%s5100_s19 + $0x8] sm:$0xff] %v3674_v1  ;;  %v3675_v3 = vadd.f32 %v5094_v26, %v3656_v31  ;;  %v3657_v36 = vmul.f32 %v4896_v30, %v3638_v32  ;;  %v3639_v11 = vadd.f32 %v3623_v17, %v3609_v59  ;;  %v3610_v37 = vadd.f32 %v3318_v34, %v2665_v28  ;;  %v3631_v28 = vld [vmem:[%s4465_s23 + $0x70] sm:$0xff]  ;;  %v3632_v31 = vld [vmem:[%s4465_s23 + $0x78] sm:$0xff] }
 0x3e5   : > { %v3387_v0 = vpop.f32.mrf.mxu1 }
 0x3e6   : > { %3689 = vst [vmem:[%s5100_s19 + $0x10] sm:$0xff] %v3675_v3  ;;  %v3676_v58 = vadd.f32 %v5094_v26, %v3657_v36  ;;  %v3658_v42 = vmul.f32 %v4896_v30, %v3639_v11  ;;  %v3640_v43 = vadd.f32 %v3624_v35, %v3610_v37  ;;  %v3611_v46 = vadd.f32 %v3387_v0, %v2734_v33 }
 0x3e7   : > { %v3389_v52 = vpop.f32.mrf.mxu1 }
 0x3e8   : > { %3690 = vst [vmem:[%s5100_s19 + $0x18] sm:$0xff] %v3676_v58  ;;  %v3677_v6 = vadd.f32 %v5094_v26, %v3658_v42  ;;  %v3659_v61 = vmul.f32 %v4896_v30, %v3640_v43  ;;  %v3641_v7 = vadd.f32 %v3625_v39, %v3611_v46  ;;  %v3612_v10 = vadd.f32 %v3389_v52, %v2736_v38 }
 0x3e9   : > { %v3458_v12 = vpop.f32.mrf.mxu1 }
 0x3ea   : > { %3691 = vst [vmem:[%s5100_s19 + $0x20] sm:$0xff] %v3677_v6  ;;  %v3678_v62 = vadd.f32 %v5094_v26, %v3659_v61  ;;  %v3660_v2 = vmul.f32 %v4896_v30, %v3641_v7  ;;  %v3642_v15 = vadd.f32 %v3626_v47, %v3612_v10  ;;  %v3613_v18 = vadd.f32 %v3458_v12, %v2805_v51 }
 0x3eb   : > { %v3460_v19 = vpop.f32.mrf.mxu1 }
 0x3ec   : > { %3692 = vst [vmem:[%s5100_s19 + $0x28] sm:$0xff] %v3678_v62  ;;  %v3679_v4 = vadd.f32 %v5094_v26, %v3660_v2  ;;  %v3661_v54 = vmul.f32 %v4896_v30, %v3642_v15  ;;  %v3643_v5 = vadd.f32 %v3627_v14, %v3613_v18  ;;  %v3614_v16 = vadd.f32 %v3460_v19, %v2807_v50 }
 0x3ed   : > { %v3529_v20 = vpop.f32.mrf.mxu1 }
 0x3ee   : > { %3693 = vst [vmem:[%s5100_s19 + $0x30] sm:$0xff] %v3679_v4  ;;  %v3680_v8 = vadd.f32 %v5094_v26, %v3661_v54  ;;  %v3662_v45 = vmul.f32 %v4896_v30, %v3643_v5  ;;  %v3644_v23 = vadd.f32 %v3628_v53, %v3614_v16  ;;  %v3615_v24 = vadd.f32 %v3529_v20, %v2876_v63 }
 0x3ef   : > { %v3531_v27 = vpop.f32.mrf.mxu1 }
 0x3f0   : > { %3694 = vst [vmem:[%s5100_s19 + $0x38] sm:$0xff] %v3680_v8  ;;  %v3681_v21 = vadd.f32 %v5094_v26, %v3662_v45  ;;  %v3663_v49 = vmul.f32 %v4896_v30, %v3644_v23  ;;  %v3645_v48 = vadd.f32 %v3629_v22, %v3615_v24  ;;  %v3616_v56 = vadd.f32 %v3531_v27, %v2878_v60 }
 0x3f1   : > { %v3600_v55 = vpop.f32.mrf.mxu1 }
 0x3f2   : > { %3695 = vst [vmem:[%s5100_s19 + $0x40] sm:$0xff] %v3681_v21  ;;  %v3682_v40 = vadd.f32 %v5094_v26, %v3663_v49  ;;  %v3664_v9 = vmul.f32 %v4896_v30, %v3645_v48  ;;  %v3646_v29 = vadd.f32 %v3630_v41, %v3616_v56  ;;  %v3617_v17 = vadd.f32 %v3600_v55, %v2947_v57 }
 0x3f3   : > { %v3602_v1 = vpop.f32.mrf.mxu1 }
 0x3f4   : > { %3696 = vst [vmem:[%s5100_s19 + $0x48] sm:$0xff] %v3682_v40  ;;  %v3683_v32 = vadd.f32 %v5094_v26, %v3664_v9  ;;  %v3665_v59 = vmul.f32 %v4896_v30, %v3646_v29  ;;  %v3647_v44 = vadd.f32 %v3631_v28, %v3617_v17  ;;  %v3618_v13 = vadd.f32 %v3602_v1, %v2949_v25 }
 0x3f6   : > { %3697 = vst [vmem:[%s5100_s19 + $0x50] sm:$0xff] %v3683_v32  ;;  %v3684_v33 = vadd.f32 %v5094_v26, %v3665_v59  ;;  %v3666_v34 = vmul.f32 %v4896_v30, %v3647_v44  ;;  %v3648_v35 = vadd.f32 %v3632_v31, %v3618_v13 }
 0x3f8   : > { %3698 = vst [vmem:[%s5100_s19 + $0x58] sm:$0xff] %v3684_v33  ;;  %v3685_v3 = vadd.f32 %v5094_v26, %v3666_v34  ;;  %v3667_v36 = vmul.f32 %v4896_v30, %v3648_v35 }
 0x3fa   : > { %3699 = vst [vmem:[%s5100_s19 + $0x60] sm:$0xff] %v3685_v3  ;;  %v3686_v11 = vadd.f32 %v5094_v26, %v3667_v36 }
 0x3fc   : > { %3700 = vst [vmem:[%s5100_s19 + $0x68] sm:$0xff] %v3686_v11 }
 0x3fd PF: > { %p4199_p5 = scmp.ge.s32.totalorder %s4353_s30, 2  ;;  %s3743_s23 = sand.u32 1, %s4341_s27  }
 0x3fe   : > { %s3744_s12 = scalar_lea.sflag [#allocation3], %s3743_s23 }
 0x3ff   : > { %p4196_p13 = pnand %p4199_p5, %p4446_p6 }
 0x401   : > { %p4197_p0 = pneg %p4196_p13 }
 0x403   : > { %4336 = dma.done.wait (%p4197_p0), %s3744_s12, 128  }
 0x404   : > { %4338 = vsyncadd (%p4197_p0), %s3744_s12, 4294967168  ;;  %p19_p1 = scmp.ge.s32.totalorder %s4429_s11, 4   ;;  %s5199_s27 = smov %s4345_s28 }
 0x405   : > { %s5200_s28 = smov %s4349_s29  ;;  %s5201_s29 = smov %s4440_s14 }
 0x406   : > { %s5202_s30 = smov %s4429_s11  ;;  %21 = sbr.rel (!%p19_p1) target bundleno = 6 (0x6), region = 99 }
 0x40b   :  { %3749 = vsyncpa [#allocation3], 1 }
 0x40c   :  { %3751 = vsyncpa [#allocation3 + $0x1], 1 }

</bundles_post_ra>
